<compile_context>
chip_gen: v6e
topology: v6e:2x2x1
jax: 0.10.0
libtpu: 0.0.40
codegen_flags: <defaults>
</compile_context>

<pallas_src>
import math

import numpy as np
import jax
import jax.numpy as jnp
from jax import lax
from jax.experimental import pallas as pl
from jax.experimental.pallas import tpu as pltpu


# ----------------------------- fused Pallas kernel ------------------------------

def _grad_agent_kernel(x5_ref, idx_ref, ts_ref,
                       t1_ref, b1_ref, t2_ref, b2_ref,
                       wf1_ref, bf1_ref, wt_ref, wi_ref, wf2_ref, bf2_ref,
                       out_ref):
    bt = out_ref.shape[1]                      # batch-tile size

    # ---- conv1: one stacked bf16 matmul.
    #      rows  = (conv-row parity e, pooled row p, batch b)
    #      lanes = [even-col conv outputs | odd-col conv outputs], each 128-padded
    x5 = x5_ref[0]                                                        # (24*bt, 280) bf16
    z1 = jnp.dot(x5, t1_ref[...], preferred_element_type=jnp.float32)    # (24*bt, 256) f32

    half = 12 * bt
    zr = jnp.maximum(z1[:half, :], z1[half:, :])          # 2x2 max-pool over rows
    y1 = jnp.maximum(zr[:, :128], zr[:, 128:])            # 2x2 max-pool over cols
    y1 = jnp.maximum(y1 + b1_ref[...], 0.0)               # bias + ReLU   (12*bt, 128)

    # ---- conv2: 5 row-shifted matmuls accumulated in f32, LHS never leaves VMEM.
    z2 = jnp.zeros((8 * bt, 256), jnp.float32)
    for ki in range(5):
        lhs = y1[ki * bt:(ki + 8) * bt, :].astype(jnp.bfloat16)           # (8*bt, 128)
        z2 = z2 + jnp.dot(lhs, t2_ref[ki], preferred_element_type=jnp.float32)
    z2 = jnp.maximum(z2[:, :128], z2[:, 128:])            # 2x2 max-pool over cols
    z2 = jnp.maximum(z2 + b2_ref[...], 0.0)               # bias + ReLU   (8*bt, 128)

    # ---- fc1: conv2 row-pool absorbed into the 4 spatial-row matmuls; the NCHW
    #      flatten is pre-folded into wf1_ref's packing, so no reshape/transpose.
    acc = jnp.zeros((bt, 150), jnp.float32)
    for pi in range(4):
        top = z2[(2 * pi) * bt:(2 * pi + 1) * bt, :]
        bot = z2[(2 * pi + 1) * bt:(2 * pi + 2) * bt, :]
        xpi = jnp.maximum(top, bot).astype(jnp.bfloat16)                  # (bt, 128)
        acc = acc + jnp.dot(xpi, wf1_ref[pi], preferred_element_type=jnp.float32)

    # timestep / idx folded into the fc1 bias (replaces the (B, 322) concat).
    t = ts_ref[0, 0]
    bias1 = bf1_ref[...] + t * wt_ref[...] + idx_ref[0] * wi_ref[...]     # (bt, 150)
    h = jnp.maximum(acc + bias1, 0.0).astype(jnp.bfloat16)

    out_ref[0] = (jnp.dot(h, wf2_ref[...], preferred_element_type=jnp.float32)
                  + bf2_ref[...])


# ------------------------------ wrapper / JAX glue ------------------------------

def _pick_bt(batch):
    for cand in (8, 4, 2):
        if batch % cand == 0:
            return cand
    return 1


def grad_agent_forward(kp, images, timestep, idx, opts):
    """images: (B, 2, 28, 28) float32 NCHW. idx: (B, 1). Returns (B, 2) float32."""
    bsz = images.shape[0]
    bt = _pick_bt(bsz)
    nt = bsz // bt

    # Rows-only im2col (~4x the raw input, vs ~18x for full im2col) + batch-tile
    # grouping.  Pure data layout on a few-KB tensor; all compute is in the kernel.
    x = jnp.transpose(images, (0, 2, 3, 1)).reshape(bsz, 28, 56)       # (B, 28, W*C)
    rows = jnp.arange(2)[:, None] + 2 * jnp.arange(12)[None, :]        # conv row = 2p + e
    taps = [x[:, rows + ki, :] for ki in range(5)]                     # 5 x (B, 2, 12, 56)
    x5 = jnp.concatenate(taps, axis=-1)                                # (B, 2, 12, 280)
    x5 = x5.reshape(nt, bt, 2, 12, 280).transpose(0, 2, 3, 1, 4)       # (nt, 2, 12, bt, 280)
    x5 = x5.reshape(nt, 24 * bt, 280).astype(jnp.bfloat16)

    idx_scaled = (idx.astype(jnp.float32) * (opts["k"] / opts["num_timesteps"]))
    idx_scaled = idx_scaled.reshape(nt, bt, 1)
    ts = jnp.full((1, 1), timestep, jnp.float32)

    def fixed(shape):
        return pl.BlockSpec(shape, lambda i, _n=len(shape): (0,) * _n)

    out = pl.pallas_call(
        _grad_agent_kernel,
        out_shape=jax.ShapeDtypeStruct((nt, bt, 2), jnp.float32),
        grid=(nt,),
        in_specs=[
            pl.BlockSpec((1, 24 * bt, 280), lambda i: (i, 0, 0)),              # x5
            pl.BlockSpec((1, bt, 1), lambda i: (i, 0, 0)),                     # idx (scaled)
            pl.BlockSpec((1, 1), lambda i: (0, 0),
                         memory_space=pltpu.MemorySpace.SMEM),                 # timestep scalar
            fixed(kp["t1"].shape),      # (280, 256)   conv1 Toeplitz (bf16)
            fixed(kp["b1row"].shape),   # (1, 128)
            fixed(kp["t2"].shape),      # (5, 128, 256) conv2 Toeplitz (bf16)
            fixed(kp["b2row"].shape),   # (1, 128)
            fixed(kp["wf1p"].shape),    # (4, 128, 150) fc1, flatten folded in (bf16)
            fixed(kp["bf1row"].shape),  # (1, 150)
            fixed(kp["wtrow"].shape),   # (1, 150)  fc1 column for timestep
            fixed(kp["wirow"].shape),   # (1, 150)  fc1 column for idx
            fixed(kp["wf2t"].shape),    # (150, 2)  (bf16)
            fixed(kp["bf2row"].shape),  # (1, 2)
        ],
        out_specs=pl.BlockSpec((1, bt, 2), lambda i: (i, 0, 0)),
        compiler_params=pltpu.CompilerParams(dimension_semantics=("parallel",)),
    )(x5, idx_scaled, ts, kp["t1"], kp["b1row"], kp["t2"], kp["b2row"],
      kp["wf1p"], kp["bf1row"], kp["wtrow"], kp["wirow"], kp["wf2t"], kp["bf2row"])
    return out.reshape(bsz, 2)


def grad_agent_sample(kp, images, adv_images, timestep, idx, opts):
    state = jnp.concatenate([images[:, None, :, :], adv_images[:, None, :, :]], axis=1)
    return grad_agent_forward(kp, state, timestep, idx, opts)


# --------------------------- params: init + offline packing ---------------------------

def _pack_kernel_params(tp):
    w1 = np.asarray(tp["w1"], np.float32)    # (10, 2, 5, 5)
    b1 = np.asarray(tp["b1"], np.float32)
    w2 = np.asarray(tp["w2"], np.float32)    # (20, 10, 5, 5)
    b2 = np.asarray(tp["b2"], np.float32)
    wf1 = np.asarray(tp["wf1"], np.float32)  # (150, 322)
    bf1 = np.asarray(tp["bf1"], np.float32)
    wf2 = np.asarray(tp["wf2"], np.float32)  # (2, 150)
    bf2 = np.asarray(tp["bf2"], np.float32)

    # conv1 Toeplitz: rows = (ki, input col jin, cin), cols = [even j | odd j] x (qj, cout)
    t1 = np.zeros((280, 256), np.float32)
    for ki in range(5):
        for jin in range(28):
            for ci in range(2):
                r = ki * 56 + jin * 2 + ci
                for ej in range(2):
                    for qj in range(12):
                        kj = jin - (2 * qj + ej)
                        if 0 <= kj < 5:
                            c0 = ej * 128 + qj * 10
                            t1[r, c0:c0 + 10] = w1[:, ci, ki, kj]

    b1row = np.zeros((1, 128), np.float32)
    for qj in range(12):
        b1row[0, qj * 10:qj * 10 + 10] = b1

    # conv2 Toeplitz per row-tap ki: rows = (pooled col qin, cin), cols as above (qj, cout)
    t2 = np.zeros((5, 128, 256), np.float32)
    for ki in range(5):
        for qin in range(12):
            for ci in range(10):
                r = qin * 10 + ci
                for ej in range(2):
                    for qj in range(4):
                        kj = qin - (2 * qj + ej)
                        if 0 <= kj < 5:
                            c0 = ej * 128 + qj * 20
                            t2[ki, r, c0:c0 + 20] = w2[:, ci, ki, kj]

    b2row = np.zeros((1, 128), np.float32)
    for qj in range(4):
        b2row[0, qj * 20:qj * 20 + 20] = b2

    # fc1 weights, PyTorch NCHW flatten (f = cout*16 + pi*4 + pj) folded into the packing.
    wf1p = np.zeros((4, 128, 150), np.float32)
    for pi in range(4):
        for pj in range(4):
            for co in range(20):
                wf1p[pi, pj * 20 + co, :] = wf1[:, co * 16 + pi * 4 + pj]

    return dict(
        t1=jnp.asarray(t1, dtype=jnp.bfloat16),
        b1row=jnp.asarray(b1row),
        t2=jnp.asarray(t2, dtype=jnp.bfloat16),
        b2row=jnp.asarray(b2row),
        wf1p=jnp.asarray(wf1p, dtype=jnp.bfloat16),
        bf1row=jnp.asarray(bf1.reshape(1, 150)),
        wtrow=jnp.asarray(wf1[:, 320].reshape(1, 150)),
        wirow=jnp.asarray(wf1[:, 321].reshape(1, 150)),
        wf2t=jnp.asarray(wf2.T.copy(), dtype=jnp.bfloat16),
        bf2row=jnp.asarray(bf2.reshape(1, 2)),
    )


def init_params(key):
    ks = jax.random.split(key, 8)

    def u(k, shape, fan_in):
        bound = 1.0 / math.sqrt(fan_in)
        return jax.random.uniform(k, shape, jnp.float32, -bound, bound)

    w1 = u(ks[0], (10, 2, 5, 5), 2 * 25);    b1 = u(ks[1], (10,), 2 * 25)
    w2 = u(ks[2], (20, 10, 5, 5), 10 * 25);  b2 = u(ks[3], (20,), 10 * 25)
    wf1 = u(ks[4], (150, 322), 322);         bf1 = u(ks[5], (150,), 322)
    wf2 = u(ks[6], (2, 150), 150);           bf2 = u(ks[7], (2,), 150)

    tp = dict(w1=w1, b1=b1, w2=w2, b2=b2, wf1=wf1, bf1=bf1, wf2=wf2, bf2=bf2)
    return tp, _pack_kernel_params(tp)


# ------------------------------- reference (pure XLA) -------------------------------

def reference_forward(tp, images, timestep, idx, opts):
    dn = ("NCHW", "OIHW", "NCHW")
    x = lax.conv_general_dilated(images, tp["w1"], (1, 1), "VALID", dimension_numbers=dn)
    x = x + tp["b1"][None, :, None, None]
    x = lax.reduce_window(x, -jnp.inf, lax.max, (1, 1, 2, 2), (1, 1, 2, 2), "VALID")
    x = jnp.maximum(x, 0.0)
    x = lax.conv_general_dilated(x, tp["w2"], (1, 1), "VALID", dimension_numbers=dn)
    x = x + tp["b2"][None, :, None, None]
    x = lax.reduce_window(x, -jnp.inf, lax.max, (1, 1, 2, 2), (1, 1, 2, 2), "VALID")
    x = jnp.maximum(x, 0.0)
    b = images.shape[0]
    flat = x.reshape(b, 320)
    tcol = jnp.full((b, 1), timestep, dtype=jnp.float32)
    icol = idx * opts["k"] / opts["num_timesteps"]
    xc = jnp.concatenate([flat, tcol, icol], axis=1)
    h = jnp.maximum(xc @ tp["wf1"].T + tp["bf1"], 0.0)
    return h @ tp["wf2"].T + tp["bf2"]


# --------------------------------------- main ---------------------------------------

if __name__ == "__main__":
    opts = {"k": 10.0, "num_timesteps": 40.0}
    key = jax.random.PRNGKey(0)
    kparam, kimg, kadv = jax.random.split(key, 3)
    torch_params, kernel_params = init_params(kparam)

    B = 2
    images = jax.random.normal(kimg, (B, 28, 28), jnp.float32)
    adv_images = images + 0.1 * jax.random.normal(kadv, (B, 28, 28), jnp.float32)
    idx = jnp.arange(1, B + 1, dtype=jnp.float32).reshape(B, 1)
    timestep = 3.0

    fwd = jax.jit(grad_agent_sample)
    out = jax.block_until_ready(fwd(kernel_params, images, adv_images, timestep, idx, opts))
    assert out.shape == (B, 2)
    assert bool(jnp.all(jnp.isfinite(out)))

    state = jnp.concatenate([images[:, None, :, :], adv_images[:, None, :, :]], axis=1)
    ref = reference_forward(torch_params, state, timestep, idx, opts)
    assert bool(jnp.allclose(out, ref, atol=5e-2, rtol=5e-2)), (out, ref)

    print("KERNEL_OK")
</pallas_src>

<mosaic_0001>
module attributes {stable_mosaic.version = 11 : i64} {
  func.func @_grad_agent_kernel(%arg0: i32, %arg1: memref<1x48x280xbf16, #tpu.memory_space<vmem>>, %arg2: memref<1x2x1xf32, #tpu.memory_space<vmem>>, %arg3: memref<1x1xf32, #tpu.memory_space<smem>>, %arg4: memref<280x256xbf16, #tpu.memory_space<vmem>>, %arg5: memref<1x128xf32, #tpu.memory_space<vmem>>, %arg6: memref<5x128x256xbf16, #tpu.memory_space<vmem>>, %arg7: memref<1x128xf32, #tpu.memory_space<vmem>>, %arg8: memref<4x128x150xbf16, #tpu.memory_space<vmem>>, %arg9: memref<1x150xf32, #tpu.memory_space<vmem>>, %arg10: memref<1x150xf32, #tpu.memory_space<vmem>>, %arg11: memref<1x150xf32, #tpu.memory_space<vmem>>, %arg12: memref<150x2xbf16, #tpu.memory_space<vmem>>, %arg13: memref<1x2xf32, #tpu.memory_space<vmem>>, %arg14: memref<1x2x2xf32, #tpu.memory_space<vmem>>) attributes {dimension_semantics = [#tpu.dimension_semantics<parallel>], iteration_bounds = array<i64: 1>, scalar_prefetch = 0 : i64, scratch_operands = 0 : i64, tpu.core_type = #tpu.core_type<tc>, window_params = [{transform_indices = @transform_0, window_bounds = array<i64: 1, 48, 280>}, {transform_indices = @transform_1, window_bounds = array<i64: 1, 2, 1>}, {transform_indices = @transform_2, window_bounds = array<i64: 1, 1>}, {pipeline_mode = #tpu.pipeline_mode<synchronous>, transform_indices = @transform_3, window_bounds = array<i64: 280, 256>}, {pipeline_mode = #tpu.pipeline_mode<synchronous>, transform_indices = @transform_4, window_bounds = array<i64: 1, 128>}, {pipeline_mode = #tpu.pipeline_mode<synchronous>, transform_indices = @transform_5, window_bounds = array<i64: 5, 128, 256>}, {pipeline_mode = #tpu.pipeline_mode<synchronous>, transform_indices = @transform_6, window_bounds = array<i64: 1, 128>}, {pipeline_mode = #tpu.pipeline_mode<synchronous>, transform_indices = @transform_7, window_bounds = array<i64: 4, 128, 150>}, {pipeline_mode = #tpu.pipeline_mode<synchronous>, transform_indices = @transform_8, window_bounds = array<i64: 1, 150>}, {pipeline_mode = #tpu.pipeline_mode<synchronous>, transform_indices = @transform_9, window_bounds = array<i64: 1, 150>}, {pipeline_mode = #tpu.pipeline_mode<synchronous>, transform_indices = @transform_10, window_bounds = array<i64: 1, 150>}, {pipeline_mode = #tpu.pipeline_mode<synchronous>, transform_indices = @transform_11, window_bounds = array<i64: 150, 2>}, {pipeline_mode = #tpu.pipeline_mode<synchronous>, transform_indices = @transform_12, window_bounds = array<i64: 1, 2>}, {transform_indices = @transform_13, window_bounds = array<i64: 1, 2, 2>}]} {
    %c0 = arith.constant 0 : index
    %c0_0 = arith.constant 0 : index
    %c0_1 = arith.constant 0 : index
    %0 = vector.load %arg1[%c0, %c0_0, %c0_1] : memref<1x48x280xbf16, #tpu.memory_space<vmem>>, vector<1x48x280xbf16>
    %1 = vector.shape_cast %0 : vector<1x48x280xbf16> to vector<48x280xbf16>
    %c0_2 = arith.constant 0 : index
    %c0_3 = arith.constant 0 : index
    %2 = vector.load %arg4[%c0_2, %c0_3] : memref<280x256xbf16, #tpu.memory_space<vmem>>, vector<280x256xbf16>
    %cst = arith.constant dense<0.000000e+00> : vector<48x256xf32>
    %3 = tpu.matmul %1, %2, %cst {dimension_numbers = #tpu.dot_dimension_numbers<[1], [0], [0], [1], [0, 0, 1, 1], [], []>} : vector<48x280xbf16>, vector<280x256xbf16>, vector<48x256xf32> -> vector<48x256xf32>
    %4 = vector.extract_strided_slice %3 {offsets = [0, 0], sizes = [24, 256], strides = [1, 1]} : vector<48x256xf32> to vector<24x256xf32>
    %5 = vector.extract_strided_slice %3 {offsets = [24, 0], sizes = [24, 256], strides = [1, 1]} : vector<48x256xf32> to vector<24x256xf32>
    %6 = arith.maximumf %4, %5 : vector<24x256xf32>
    %7 = vector.extract_strided_slice %6 {offsets = [0, 0], sizes = [24, 128], strides = [1, 1]} : vector<24x256xf32> to vector<24x128xf32>
    %8 = vector.extract_strided_slice %6 {offsets = [0, 128], sizes = [24, 128], strides = [1, 1]} : vector<24x256xf32> to vector<24x128xf32>
    %9 = arith.maximumf %7, %8 : vector<24x128xf32>
    %c0_4 = arith.constant 0 : index
    %c0_5 = arith.constant 0 : index
    %10 = vector.load %arg5[%c0_4, %c0_5] : memref<1x128xf32, #tpu.memory_space<vmem>>, vector<1x128xf32>
    %11 = vector.broadcast %10 : vector<1x128xf32> to vector<24x128xf32>
    %12 = arith.addf %9, %11 : vector<24x128xf32>
    %cst_6 = arith.constant 0.000000e+00 : f32
    %13 = vector.broadcast %cst_6 : f32 to vector<24x128xf32>
    %14 = arith.maximumf %12, %13 : vector<24x128xf32>
    %cst_7 = arith.constant 0.000000e+00 : f32
    %15 = vector.broadcast %cst_7 : f32 to vector<16x256xf32>
    %16 = vector.extract_strided_slice %14 {offsets = [0, 0], sizes = [16, 128], strides = [1, 1]} : vector<24x128xf32> to vector<16x128xf32>
    %17 = arith.truncf %16 : vector<16x128xf32> to vector<16x128xbf16>
    %c0_8 = arith.constant 0 : index
    %c0_9 = arith.constant 0 : index
    %c0_10 = arith.constant 0 : index
    %18 = vector.load %arg6[%c0_8, %c0_9, %c0_10] : memref<5x128x256xbf16, #tpu.memory_space<vmem>>, vector<1x128x256xbf16>
    %19 = vector.shape_cast %18 : vector<1x128x256xbf16> to vector<128x256xbf16>
    %cst_11 = arith.constant dense<0.000000e+00> : vector<16x256xf32>
    %20 = tpu.matmul %17, %19, %cst_11 {dimension_numbers = #tpu.dot_dimension_numbers<[1], [0], [0], [1], [0, 0, 1, 1], [], []>} : vector<16x128xbf16>, vector<128x256xbf16>, vector<16x256xf32> -> vector<16x256xf32>
    %21 = arith.addf %15, %20 : vector<16x256xf32>
    %22 = vector.extract_strided_slice %14 {offsets = [2, 0], sizes = [16, 128], strides = [1, 1]} : vector<24x128xf32> to vector<16x128xf32>
    %23 = arith.truncf %22 : vector<16x128xf32> to vector<16x128xbf16>
    %c1 = arith.constant 1 : index
    %c0_12 = arith.constant 0 : index
    %c0_13 = arith.constant 0 : index
    %24 = vector.load %arg6[%c1, %c0_12, %c0_13] : memref<5x128x256xbf16, #tpu.memory_space<vmem>>, vector<1x128x256xbf16>
    %25 = vector.shape_cast %24 : vector<1x128x256xbf16> to vector<128x256xbf16>
    %cst_14 = arith.constant dense<0.000000e+00> : vector<16x256xf32>
    %26 = tpu.matmul %23, %25, %cst_14 {dimension_numbers = #tpu.dot_dimension_numbers<[1], [0], [0], [1], [0, 0, 1, 1], [], []>} : vector<16x128xbf16>, vector<128x256xbf16>, vector<16x256xf32> -> vector<16x256xf32>
    %27 = arith.addf %21, %26 : vector<16x256xf32>
    %28 = vector.extract_strided_slice %14 {offsets = [4, 0], sizes = [16, 128], strides = [1, 1]} : vector<24x128xf32> to vector<16x128xf32>
    %29 = arith.truncf %28 : vector<16x128xf32> to vector<16x128xbf16>
    %c2 = arith.constant 2 : index
    %c0_15 = arith.constant 0 : index
    %c0_16 = arith.constant 0 : index
    %30 = vector.load %arg6[%c2, %c0_15, %c0_16] : memref<5x128x256xbf16, #tpu.memory_space<vmem>>, vector<1x128x256xbf16>
    %31 = vector.shape_cast %30 : vector<1x128x256xbf16> to vector<128x256xbf16>
    %cst_17 = arith.constant dense<0.000000e+00> : vector<16x256xf32>
    %32 = tpu.matmul %29, %31, %cst_17 {dimension_numbers = #tpu.dot_dimension_numbers<[1], [0], [0], [1], [0, 0, 1, 1], [], []>} : vector<16x128xbf16>, vector<128x256xbf16>, vector<16x256xf32> -> vector<16x256xf32>
    %33 = arith.addf %27, %32 : vector<16x256xf32>
    %34 = vector.extract_strided_slice %14 {offsets = [6, 0], sizes = [16, 128], strides = [1, 1]} : vector<24x128xf32> to vector<16x128xf32>
    %35 = arith.truncf %34 : vector<16x128xf32> to vector<16x128xbf16>
    %c3 = arith.constant 3 : index
    %c0_18 = arith.constant 0 : index
    %c0_19 = arith.constant 0 : index
    %36 = vector.load %arg6[%c3, %c0_18, %c0_19] : memref<5x128x256xbf16, #tpu.memory_space<vmem>>, vector<1x128x256xbf16>
    %37 = vector.shape_cast %36 : vector<1x128x256xbf16> to vector<128x256xbf16>
    %cst_20 = arith.constant dense<0.000000e+00> : vector<16x256xf32>
    %38 = tpu.matmul %35, %37, %cst_20 {dimension_numbers = #tpu.dot_dimension_numbers<[1], [0], [0], [1], [0, 0, 1, 1], [], []>} : vector<16x128xbf16>, vector<128x256xbf16>, vector<16x256xf32> -> vector<16x256xf32>
    %39 = arith.addf %33, %38 : vector<16x256xf32>
    %40 = vector.extract_strided_slice %14 {offsets = [8, 0], sizes = [16, 128], strides = [1, 1]} : vector<24x128xf32> to vector<16x128xf32>
    %41 = arith.truncf %40 : vector<16x128xf32> to vector<16x128xbf16>
    %c4 = arith.constant 4 : index
    %c0_21 = arith.constant 0 : index
    %c0_22 = arith.constant 0 : index
    %42 = vector.load %arg6[%c4, %c0_21, %c0_22] : memref<5x128x256xbf16, #tpu.memory_space<vmem>>, vector<1x128x256xbf16>
    %43 = vector.shape_cast %42 : vector<1x128x256xbf16> to vector<128x256xbf16>
    %cst_23 = arith.constant dense<0.000000e+00> : vector<16x256xf32>
    %44 = tpu.matmul %41, %43, %cst_23 {dimension_numbers = #tpu.dot_dimension_numbers<[1], [0], [0], [1], [0, 0, 1, 1], [], []>} : vector<16x128xbf16>, vector<128x256xbf16>, vector<16x256xf32> -> vector<16x256xf32>
    %45 = arith.addf %39, %44 : vector<16x256xf32>
    %46 = vector.extract_strided_slice %45 {offsets = [0, 0], sizes = [16, 128], strides = [1, 1]} : vector<16x256xf32> to vector<16x128xf32>
    %47 = vector.extract_strided_slice %45 {offsets = [0, 128], sizes = [16, 128], strides = [1, 1]} : vector<16x256xf32> to vector<16x128xf32>
    %48 = arith.maximumf %46, %47 : vector<16x128xf32>
    %c0_24 = arith.constant 0 : index
    %c0_25 = arith.constant 0 : index
    %49 = vector.load %arg7[%c0_24, %c0_25] : memref<1x128xf32, #tpu.memory_space<vmem>>, vector<1x128xf32>
    %50 = vector.broadcast %49 : vector<1x128xf32> to vector<16x128xf32>
    %51 = arith.addf %48, %50 : vector<16x128xf32>
    %cst_26 = arith.constant 0.000000e+00 : f32
    %52 = vector.broadcast %cst_26 : f32 to vector<16x128xf32>
    %53 = arith.maximumf %51, %52 : vector<16x128xf32>
    %cst_27 = arith.constant 0.000000e+00 : f32
    %54 = vector.broadcast %cst_27 : f32 to vector<2x150xf32>
    %55 = vector.extract_strided_slice %53 {offsets = [0, 0], sizes = [2, 128], strides = [1, 1]} : vector<16x128xf32> to vector<2x128xf32>
    %56 = vector.extract_strided_slice %53 {offsets = [2, 0], sizes = [2, 128], strides = [1, 1]} : vector<16x128xf32> to vector<2x128xf32>
    %57 = arith.maximumf %55, %56 : vector<2x128xf32>
    %58 = arith.truncf %57 : vector<2x128xf32> to vector<2x128xbf16>
    %c0_28 = arith.constant 0 : index
    %c0_29 = arith.constant 0 : index
    %c0_30 = arith.constant 0 : index
    %59 = vector.load %arg8[%c0_28, %c0_29, %c0_30] : memref<4x128x150xbf16, #tpu.memory_space<vmem>>, vector<1x128x150xbf16>
    %60 = vector.shape_cast %59 : vector<1x128x150xbf16> to vector<128x150xbf16>
    %cst_31 = arith.constant dense<0.000000e+00> : vector<2x150xf32>
    %61 = tpu.matmul %58, %60, %cst_31 {dimension_numbers = #tpu.dot_dimension_numbers<[1], [0], [0], [1], [0, 0, 1, 1], [], []>} : vector<2x128xbf16>, vector<128x150xbf16>, vector<2x150xf32> -> vector<2x150xf32>
    %62 = arith.addf %54, %61 : vector<2x150xf32>
    %63 = vector.extract_strided_slice %53 {offsets = [4, 0], sizes = [2, 128], strides = [1, 1]} : vector<16x128xf32> to vector<2x128xf32>
    %64 = vector.extract_strided_slice %53 {offsets = [6, 0], sizes = [2, 128], strides = [1, 1]} : vector<16x128xf32> to vector<2x128xf32>
    %65 = arith.maximumf %63, %64 : vector<2x128xf32>
    %66 = arith.truncf %65 : vector<2x128xf32> to vector<2x128xbf16>
    %c1_32 = arith.constant 1 : index
    %c0_33 = arith.constant 0 : index
    %c0_34 = arith.constant 0 : index
    %67 = vector.load %arg8[%c1_32, %c0_33, %c0_34] : memref<4x128x150xbf16, #tpu.memory_space<vmem>>, vector<1x128x150xbf16>
    %68 = vector.shape_cast %67 : vector<1x128x150xbf16> to vector<128x150xbf16>
    %cst_35 = arith.constant dense<0.000000e+00> : vector<2x150xf32>
    %69 = tpu.matmul %66, %68, %cst_35 {dimension_numbers = #tpu.dot_dimension_numbers<[1], [0], [0], [1], [0, 0, 1, 1], [], []>} : vector<2x128xbf16>, vector<128x150xbf16>, vector<2x150xf32> -> vector<2x150xf32>
    %70 = arith.addf %62, %69 : vector<2x150xf32>
    %71 = vector.extract_strided_slice %53 {offsets = [8, 0], sizes = [2, 128], strides = [1, 1]} : vector<16x128xf32> to vector<2x128xf32>
    %72 = vector.extract_strided_slice %53 {offsets = [10, 0], sizes = [2, 128], strides = [1, 1]} : vector<16x128xf32> to vector<2x128xf32>
    %73 = arith.maximumf %71, %72 : vector<2x128xf32>
    %74 = arith.truncf %73 : vector<2x128xf32> to vector<2x128xbf16>
    %c2_36 = arith.constant 2 : index
    %c0_37 = arith.constant 0 : index
    %c0_38 = arith.constant 0 : index
    %75 = vector.load %arg8[%c2_36, %c0_37, %c0_38] : memref<4x128x150xbf16, #tpu.memory_space<vmem>>, vector<1x128x150xbf16>
    %76 = vector.shape_cast %75 : vector<1x128x150xbf16> to vector<128x150xbf16>
    %cst_39 = arith.constant dense<0.000000e+00> : vector<2x150xf32>
    %77 = tpu.matmul %74, %76, %cst_39 {dimension_numbers = #tpu.dot_dimension_numbers<[1], [0], [0], [1], [0, 0, 1, 1], [], []>} : vector<2x128xbf16>, vector<128x150xbf16>, vector<2x150xf32> -> vector<2x150xf32>
    %78 = arith.addf %70, %77 : vector<2x150xf32>
    %79 = vector.extract_strided_slice %53 {offsets = [12, 0], sizes = [2, 128], strides = [1, 1]} : vector<16x128xf32> to vector<2x128xf32>
    %80 = vector.extract_strided_slice %53 {offsets = [14, 0], sizes = [2, 128], strides = [1, 1]} : vector<16x128xf32> to vector<2x128xf32>
    %81 = arith.maximumf %79, %80 : vector<2x128xf32>
    %82 = arith.truncf %81 : vector<2x128xf32> to vector<2x128xbf16>
    %c3_40 = arith.constant 3 : index
    %c0_41 = arith.constant 0 : index
    %c0_42 = arith.constant 0 : index
    %83 = vector.load %arg8[%c3_40, %c0_41, %c0_42] : memref<4x128x150xbf16, #tpu.memory_space<vmem>>, vector<1x128x150xbf16>
    %84 = vector.shape_cast %83 : vector<1x128x150xbf16> to vector<128x150xbf16>
    %cst_43 = arith.constant dense<0.000000e+00> : vector<2x150xf32>
    %85 = tpu.matmul %82, %84, %cst_43 {dimension_numbers = #tpu.dot_dimension_numbers<[1], [0], [0], [1], [0, 0, 1, 1], [], []>} : vector<2x128xbf16>, vector<128x150xbf16>, vector<2x150xf32> -> vector<2x150xf32>
    %86 = arith.addf %78, %85 : vector<2x150xf32>
    %c0_44 = arith.constant 0 : index
    %c0_45 = arith.constant 0 : index
    %87 = memref.load %arg3[%c0_44, %c0_45] : memref<1x1xf32, #tpu.memory_space<smem>>
    %c0_46 = arith.constant 0 : index
    %c0_47 = arith.constant 0 : index
    %88 = vector.load %arg9[%c0_46, %c0_47] : memref<1x150xf32, #tpu.memory_space<vmem>>, vector<1x150xf32>
    %c0_48 = arith.constant 0 : index
    %c0_49 = arith.constant 0 : index
    %89 = vector.load %arg10[%c0_48, %c0_49] : memref<1x150xf32, #tpu.memory_space<vmem>>, vector<1x150xf32>
    %90 = vector.broadcast %87 : f32 to vector<1x150xf32>
    %91 = arith.mulf %90, %89 : vector<1x150xf32>
    %92 = arith.addf %88, %91 : vector<1x150xf32>
    %c0_50 = arith.constant 0 : index
    %c0_51 = arith.constant 0 : index
    %c0_52 = arith.constant 0 : index
    %93 = vector.load %arg2[%c0_50, %c0_51, %c0_52] : memref<1x2x1xf32, #tpu.memory_space<vmem>>, vector<1x2x1xf32>
    %94 = vector.shape_cast %93 : vector<1x2x1xf32> to vector<2x1xf32>
    %c0_53 = arith.constant 0 : index
    %c0_54 = arith.constant 0 : index
    %95 = vector.load %arg11[%c0_53, %c0_54] : memref<1x150xf32, #tpu.memory_space<vmem>>, vector<1x150xf32>
    %96 = vector.broadcast %94 : vector<2x1xf32> to vector<2x150xf32>
    %97 = vector.broadcast %95 : vector<1x150xf32> to vector<2x150xf32>
    %98 = arith.mulf %96, %97 : vector<2x150xf32>
    %99 = vector.broadcast %92 : vector<1x150xf32> to vector<2x150xf32>
    %100 = arith.addf %99, %98 : vector<2x150xf32>
    %101 = arith.addf %86, %100 : vector<2x150xf32>
    %cst_55 = arith.constant 0.000000e+00 : f32
    %102 = vector.broadcast %cst_55 : f32 to vector<2x150xf32>
    %103 = arith.maximumf %101, %102 : vector<2x150xf32>
    %104 = arith.truncf %103 : vector<2x150xf32> to vector<2x150xbf16>
    %c0_56 = arith.constant 0 : index
    %c0_57 = arith.constant 0 : index
    %105 = vector.load %arg12[%c0_56, %c0_57] : memref<150x2xbf16, #tpu.memory_space<vmem>>, vector<150x2xbf16>
    %cst_58 = arith.constant dense<0.000000e+00> : vector<2x2xf32>
    %106 = tpu.matmul %104, %105, %cst_58 {dimension_numbers = #tpu.dot_dimension_numbers<[1], [0], [0], [1], [0, 0, 1, 1], [], []>} : vector<2x150xbf16>, vector<150x2xbf16>, vector<2x2xf32> -> vector<2x2xf32>
    %c0_59 = arith.constant 0 : index
    %c0_60 = arith.constant 0 : index
    %107 = vector.load %arg13[%c0_59, %c0_60] : memref<1x2xf32, #tpu.memory_space<vmem>>, vector<1x2xf32>
    %108 = vector.broadcast %107 : vector<1x2xf32> to vector<2x2xf32>
    %109 = arith.addf %106, %108 : vector<2x2xf32>
    %c0_61 = arith.constant 0 : index
    %c0_62 = arith.constant 0 : index
    %c0_63 = arith.constant 0 : index
    %110 = vector.load %arg14[%c0_61, %c0_62, %c0_63] : memref<1x2x2xf32, #tpu.memory_space<vmem>>, vector<1x2x2xf32>
    %111 = vector.shape_cast %110 : vector<1x2x2xf32> to vector<2x2xf32>
    %112 = vector.shape_cast %109 : vector<2x2xf32> to vector<1x2x2xf32>
    tpu.vector_store %arg14[%c0_61, %c0_62, %c0_63], %112 {strides = array<i32>} : memref<1x2x2xf32, #tpu.memory_space<vmem>>, vector<1x2x2xf32>,
    return
  }
  func.func @transform_0(%arg0: i32) -> (i32, i32, i32) {
    %c0_i32 = arith.constant 0 : i32
    %c0_i32_0 = arith.constant 0 : i32
    %c0_i32_1 = arith.constant 0 : i32
    return %arg0, %c0_i32, %c0_i32_0 : i32, i32, i32
  }
  func.func @transform_1(%arg0: i32) -> (i32, i32, i32) {
    %c0_i32 = arith.constant 0 : i32
    %c0_i32_0 = arith.constant 0 : i32
    %c0_i32_1 = arith.constant 0 : i32
    return %arg0, %c0_i32, %c0_i32_0 : i32, i32, i32
  }
  func.func @transform_2(%arg0: i32) -> (i32, i32) {
    %c0_i32 = arith.constant 0 : i32
    %c0_i32_0 = arith.constant 0 : i32
    %c0_i32_1 = arith.constant 0 : i32
    return %c0_i32, %c0_i32_0 : i32, i32
  }
  func.func @transform_3(%arg0: i32) -> (i32, i32) {
    %c0_i32 = arith.constant 0 : i32
    %c0_i32_0 = arith.constant 0 : i32
    %c0_i32_1 = arith.constant 0 : i32
    return %c0_i32, %c0_i32_0 : i32, i32
  }
  func.func @transform_4(%arg0: i32) -> (i32, i32) {
    %c0_i32 = arith.constant 0 : i32
    %c0_i32_0 = arith.constant 0 : i32
    %c0_i32_1 = arith.constant 0 : i32
    return %c0_i32, %c0_i32_0 : i32, i32
  }
  func.func @transform_5(%arg0: i32) -> (i32, i32, i32) {
    %c0_i32 = arith.constant 0 : i32
    %c0_i32_0 = arith.constant 0 : i32
    %c0_i32_1 = arith.constant 0 : i32
    %c0_i32_2 = arith.constant 0 : i32
    return %c0_i32, %c0_i32_0, %c0_i32_1 : i32, i32, i32
  }
  func.func @transform_6(%arg0: i32) -> (i32, i32) {
    %c0_i32 = arith.constant 0 : i32
    %c0_i32_0 = arith.constant 0 : i32
    %c0_i32_1 = arith.constant 0 : i32
    return %c0_i32, %c0_i32_0 : i32, i32
  }
  func.func @transform_7(%arg0: i32) -> (i32, i32, i32) {
    %c0_i32 = arith.constant 0 : i32
    %c0_i32_0 = arith.constant 0 : i32
    %c0_i32_1 = arith.constant 0 : i32
    %c0_i32_2 = arith.constant 0 : i32
    return %c0_i32, %c0_i32_0, %c0_i32_1 : i32, i32, i32
  }
  func.func @transform_8(%arg0: i32) -> (i32, i32) {
    %c0_i32 = arith.constant 0 : i32
    %c0_i32_0 = arith.constant 0 : i32
    %c0_i32_1 = arith.constant 0 : i32
    return %c0_i32, %c0_i32_0 : i32, i32
  }
  func.func @transform_9(%arg0: i32) -> (i32, i32) {
    %c0_i32 = arith.constant 0 : i32
    %c0_i32_0 = arith.constant 0 : i32
    %c0_i32_1 = arith.constant 0 : i32
    return %c0_i32, %c0_i32_0 : i32, i32
  }
  func.func @transform_10(%arg0: i32) -> (i32, i32) {
    %c0_i32 = arith.constant 0 : i32
    %c0_i32_0 = arith.constant 0 : i32
    %c0_i32_1 = arith.constant 0 : i32
    return %c0_i32, %c0_i32_0 : i32, i32
  }
  func.func @transform_11(%arg0: i32) -> (i32, i32) {
    %c0_i32 = arith.constant 0 : i32
    %c0_i32_0 = arith.constant 0 : i32
    %c0_i32_1 = arith.constant 0 : i32
    return %c0_i32, %c0_i32_0 : i32, i32
  }
  func.func @transform_12(%arg0: i32) -> (i32, i32) {
    %c0_i32 = arith.constant 0 : i32
    %c0_i32_0 = arith.constant 0 : i32
    %c0_i32_1 = arith.constant 0 : i32
    return %c0_i32, %c0_i32_0 : i32, i32
  }
  func.func @transform_13(%arg0: i32) -> (i32, i32, i32) {
    %c0_i32 = arith.constant 0 : i32
    %c0_i32_0 = arith.constant 0 : i32
    %c0_i32_1 = arith.constant 0 : i32
    return %arg0, %c0_i32, %c0_i32_0 : i32, i32, i32
  }
}

</mosaic_0001>

<bundles_post_ra>
// kernel: grad_agent_sample.1
= control target key start
LH: loop header
LB: loop body
LE: loop exit
PB: predicated region body
PF: predicated region fallthrough
CT: control target
= control target key end

     0   :  { %v2621_v2 = vmov 0   ;;  %vm324_vm0 = vcmask 1043456   ;;  %vm314_vm1 = vcmask 195584   ;;  %s3361_s0 = inlined_call_operand.vmem [shape: bf16[1,48,280], index: 0, kind: input, shape index: {}]   ;;  %s3362_s1 = inlined_call_operand.vmem [shape: f32[1,2,1], index: 1, kind: input, shape index: {}]   ;;  %s3363_s2 = inlined_call_operand.<no memory space> [shape: f32[1,1], index: 2, kind: input, shape index: {}]   ;;  %s3364_s3 = inlined_call_operand.vmem [shape: bf16[280,256], index: 3, kind: input, shape index: {}]   ;;  %s3365_s4 = inlined_call_operand.vmem [shape: f32[1,128], index: 4, kind: input, shape index: {}]   ;;  %s3366_s5 = inlined_call_operand.vmem [shape: bf16[5,128,256], index: 5, kind: input, shape index: {}]   ;;  %s3367_s6 = inlined_call_operand.vmem [shape: f32[1,128], index: 6, kind: input, shape index: {}]   ;;  %s3368_s7 = inlined_call_operand.vmem [shape: bf16[4,128,150], index: 7, kind: input, shape index: {}]   ;;  %s3369_s8 = inlined_call_operand.vmem [shape: f32[1,150], index: 8, kind: input, shape index: {}]   ;;  %s3370_s9 = inlined_call_operand.vmem [shape: f32[1,150], index: 9, kind: input, shape index: {}]   ;;  %s3371_s10 = inlined_call_operand.vmem [shape: f32[1,150], index: 10, kind: input, shape index: {}]   ;;  %s3372_s11 = inlined_call_operand.vmem [shape: bf16[150,2], index: 11, kind: input, shape index: {}]   ;;  %s3373_s12 = inlined_call_operand.vmem [shape: f32[1,2], index: 12, kind: input, shape index: {}]   ;;  %s3374_s13 = inlined_call_operand.hbm [shape: f32[1,2,2], index: 13, kind: output, shape index: {}]  }
   0x1   :  { %v2308_v0 = vld [vmem:[%s3364_s3 + $0x74] ss:$8 sps:$4 sm:$0xff]   ;;  %v2310_v1 = vld [vmem:[%s3364_s3 + $0x70] ss:$8 sps:$4 sm:$0xff]   ;;  %426 = vmatprep.mubr.bf16.mxu1 %v2621_v2  ;;  %2307 = vset.pattern.permute.xlu0 %v2621_v2  ;;  %v2311_v3 = vld [vmem:[%s3364_s3 + $0x64] ss:$8 sps:$4 sm:$0xff]  }
   0x2   :  { %331 = vmatprep.subr.bf16.mxu0 %v2308_v0  ;;  %v2313_v4 = vld [vmem:[%s3364_s3 + $0x60] ss:$8 sps:$4 sm:$0xff]   ;;  %v2314_v5 = vld [vmem:[%s3364_s3 + $0x54] ss:$8 sps:$4 sm:$0xff]   ;;  %v2316_v6 = vld [vmem:[%s3364_s3 + $0x50] ss:$8 sps:$4 sm:$0xff]  }
   0x3   :  { %332 = vmatpush1.bf16.msra.mxu0 %v2310_v1  ;;  %v2317_v7 = vld [vmem:[%s3364_s3 + $0x44] ss:$8 sps:$4 sm:$0xff]   ;;  %v2319_v8 = vld [vmem:[%s3364_s3 + $0x40] ss:$8 sps:$4 sm:$0xff]   ;;  %v2320_v9 = vld [vmem:[%s3364_s3 + $0x34] ss:$8 sps:$4 sm:$0xff]  }
   0x4   :  { %333 = vmatprep.subr.bf16.mxu0 %v2311_v3  ;;  %v2322_v10 = vld [vmem:[%s3364_s3 + $0x30] ss:$8 sps:$4 sm:$0xff]   ;;  %v2323_v11 = vld [vmem:[%s3364_s3 + $0x24] ss:$8 sps:$4 sm:$0xff]   ;;  %v2325_v13 = vld [vmem:[%s3364_s3 + $0x20] ss:$8 sps:$4 sm:$0xff]  }
   0x5   :  { %v93_v12 = vld [vmem:[%s3364_s3 + $0x110] sm:$0xff]  ;;  %v2352_v16 = vld [vmem:[%s3364_s3 + $0x104] ss:$8 sps:$4 sm:$0xff]   ;;  %v2354_v19 = vld [vmem:[%s3364_s3 + $0x100] ss:$8 sps:$4 sm:$0xff]  }
   0x6   :  { %v2030_v14 = vcombine.high %v93_v12, %v93_v12  ;;  %v2029_v15 = vcombine.low %v93_v12, %v93_v12  ;;  %v2326_v17 = vld [vmem:[%s3364_s3 + $0x14] ss:$8 sps:$4 sm:$0xff]   ;;  %v2328_v20 = vld [vmem:[%s3364_s3 + $0x10] ss:$8 sps:$4 sm:$0xff]   ;;  %v2329_v21 = vld [vmem:[%s3364_s3 + $0x4] ss:$8 sps:$4 sm:$0xff]  }
   0x7   :  { %334 = vmatpush1.bf16.msra.mxu0 %v2313_v4  ;;  %v2358_v22 = vld [vmem:[%s3361_s0 + $0x8] ss:$12 sps:$4 sm:$0xff]   ;;  %v2364_v23 = vld [vmem:[%s3361_s0 + $0x4] ss:$12 sps:$4 sm:$0xff]   ;;  %v2365_v28 = vld [vmem:[%s3361_s0 + $0x20] ss:$12 sps:$4 sm:$0xff]  }
   0x8   :  { %335 = vmatprep.subr.bf16.mxu0 %v2314_v5  ;;  %2031 = vmatprep.subr.msk.bf16.mxu1 %vm324_vm0, %v2030_v14  ;;  %v326_v18 = vsel %vm324_vm0, %v2029_v15, 0  ;;  %v2331_v24 = vld [vmem:[%s3364_s3] ss:$8 sps:$4 sm:$0xff]   ;;  %v2332_v25 = vld [vmem:[%s3364_s3 + $0xf4] ss:$8 sps:$4 sm:$0xff]  }
   0x9   :  { %407 = vmatpush1.bf16.msra.mxu1 %v326_v18  ;;  %363 = vmatprep.mubr.bf16.mxu0 %v2364_v23  ;;  %v2334_v26 = vld [vmem:[%s3364_s3 + $0xf0] ss:$8 sps:$4 sm:$0xff]   ;;  %v2335_v27 = vld [vmem:[%s3364_s3 + $0xe4] ss:$8 sps:$4 sm:$0xff]   ;;  %v2337_v29 = vld [vmem:[%s3364_s3 + $0xe0] ss:$8 sps:$4 sm:$0xff]  }
   0xa   :  { %408 = vmatprep.subr.bf16.mxu1 %v2352_v16  ;;  %v2338_v30 = vld [vmem:[%s3364_s3 + $0xd4] ss:$8 sps:$4 sm:$0xff]   ;;  %v2340_v31 = vld [vmem:[%s3364_s3 + $0xd0] ss:$8 sps:$4 sm:$0xff]   ;;  %v2341_v32 = vld [vmem:[%s3364_s3 + $0xc4] ss:$8 sps:$4 sm:$0xff]  }
   0xb   :  { %336 = vmatpush1.bf16.msra.mxu0 %v2316_v6  ;;  %v2369_v33 = vld [vmem:[%s3361_s0 + $0x38] ss:$12 sps:$4 sm:$0xff]   ;;  %v2343_v34 = vld [vmem:[%s3364_s3 + $0xc0] ss:$8 sps:$4 sm:$0xff]   ;;  %v2344_v35 = vld [vmem:[%s3364_s3 + $0xb4] ss:$8 sps:$4 sm:$0xff]  }
   0xc   :  { %337 = vmatprep.subr.bf16.mxu0 %v2317_v7  ;;  %v2346_v36 = vld [vmem:[%s3364_s3 + $0xb0] ss:$8 sps:$4 sm:$0xff]   ;;  %v2349_v37 = vld [vmem:[%s3364_s3 + $0xa4] ss:$8 sps:$4 sm:$0xff]   ;;  %v2351_v38 = vld [vmem:[%s3364_s3 + $0xa0] ss:$8 sps:$4 sm:$0xff]  }
   0xd   :  { %409 = vmatpush1.bf16.msra.mxu1 %v2354_v19  ;;  %v2355_v39 = vld [vmem:[%s3364_s3 + $0x94] ss:$8 sps:$4 sm:$0xff]   ;;  %v2357_v40 = vld [vmem:[%s3364_s3 + $0x90] ss:$8 sps:$4 sm:$0xff]   ;;  %v2359_v41 = vld [vmem:[%s3364_s3 + $0x84] ss:$8 sps:$4 sm:$0xff]  }
   0xe   :  { %v2361_v42 = vld [vmem:[%s3364_s3 + $0x80] ss:$8 sps:$4 sm:$0xff]   ;;  %v2368_v45 = vld [vmem:[%s3361_s0 + $0x18] ss:$12 sps:$4 sm:$0xff]   ;;  %v2372_v47 = vld [vmem:[%s3361_s0 + $0x30] ss:$12 sps:$4 sm:$0xff]  }
   0xf   :  { %338 = vmatpush1.bf16.msra.mxu0 %v2319_v8  ;;  %v2362_v43 = vld [vmem:[%s3361_s0] ss:$12 sps:$4 sm:$0xff]   ;;  %v2366_v44 = vld [vmem:[%s3361_s0 + $0x1c] ss:$12 sps:$4 sm:$0xff]  }
  0x10   :  { %339 = vmatprep.subr.bf16.mxu0 %v2320_v9  ;;  %2032 = vmatmul.mubr.msk.bf16.vlgmr.msra.gmra.mxu1 %vm314_vm1, %v2358_v22  ;;  %v2370_v46 = vld [vmem:[%s3361_s0 + $0x34] ss:$12 sps:$4 sm:$0xff]  }
  0x11   :  { %436 = vmatprep.mubr.bf16.mxu1 %v2621_v2 }
  0x13   :  { %340 = vmatpush1.bf16.msra.mxu0 %v2322_v10 }
  0x14   :  { %341 = vmatprep.subr.bf16.mxu0 %v2323_v11 }
  0x17   :  { %342 = vmatpush1.bf16.msra.mxu0 %v2325_v13 }
  0x18   :  { %343 = vmatprep.subr.bf16.mxu0 %v2326_v17  ;;  %2033 = vmatmul.mubr.msk.bf16.gmra.mxu1 %vm314_vm1, %v2365_v28 }
  0x19   :  { %446 = vmatprep.mubr.bf16.mxu1 %v2621_v2 }
  0x1b   :  { %344 = vmatpush1.bf16.msra.mxu0 %v2328_v20 }
  0x1c   :  { %345 = vmatprep.subr.bf16.mxu0 %v2329_v21 }
  0x1f   :  { %346 = vmatpush1.bf16.msra.mxu0 %v2331_v24 }
  0x20   :  { %347 = vmatprep.subr.bf16.mxu0 %v2332_v25  ;;  %2034 = vmatmul.mubr.msk.bf16.gmra.mxu1 %vm314_vm1, %v2369_v33 }
  0x21   :  { %633 = vmatprep.mubr.bf16.mxu1 %v2621_v2 }
  0x23   :  { %348 = vmatpush2.bf16.msra.mxu0 %v2334_v26 }
  0x24   :  { %349 = vmatprep.subr.bf16.mxu0 %v2335_v27 }
  0x27   :  { %350 = vmatpush2.bf16.msra.mxu0 %v2337_v29 }
  0x28   :  { %351 = vmatprep.subr.bf16.mxu0 %v2338_v30 }
  0x2b   :  { %352 = vmatpush2.bf16.msra.mxu0 %v2340_v31 }
  0x2c   :  { %353 = vmatprep.subr.bf16.mxu0 %v2341_v32 }
  0x2f   :  { %354 = vmatpush2.bf16.msra.mxu0 %v2343_v34 }
  0x30   :  { %355 = vmatprep.subr.bf16.mxu0 %v2344_v35 }
  0x33   :  { %356 = vmatpush2.bf16.msra.mxu0 %v2346_v36 }
  0x34   :  { %357 = vmatprep.subr.bf16.mxu0 %v2349_v37 }
  0x37   :  { %358 = vmatpush2.bf16.msra.mxu0 %v2351_v38 }
  0x38   :  { %359 = vmatprep.subr.bf16.mxu0 %v2355_v39 }
  0x3b   :  { %360 = vmatpush2.bf16.msra.mxu0 %v2357_v40 }
  0x3c   :  { %361 = vmatprep.subr.bf16.mxu0 %v2359_v41 }
  0x3f   :  { %362 = vmatpush2.bf16.msra.mxu0 %v2361_v42 }
  0x42   :  { %364 = vmatmul.mubr.bf16.vlgmr.msra.gmra.mxu0 %v2362_v43 }
  0x43   :  { %373 = vmatprep.mubr.bf16.mxu0 %v2366_v44 }
  0x4a   :  { %374 = vmatmul.mubr.bf16.gmra.mxu0 %v2368_v45 }
  0x4b   :  { %383 = vmatprep.mubr.bf16.mxu0 %v2370_v46 }
  0x52   :  { %384 = vmatmul.mubr.bf16.gmra.mxu0 %v2372_v47 }
  0x53   :  { %901 = vmatprep.mubr.bf16.mxu0 %v2621_v2 }
  0x54   :  { %19 = vsyncpa [#allocation4], 0  ;;  %v2375_v48 = vld [vmem:[%s3366_s5 + $0xf4] ss:$8 sps:$4 sm:$0xff]   ;;  %v2373_v50 = vld [vmem:[%s3366_s5 + $0xf0] ss:$8 sps:$4 sm:$0xff]  }
  0x55   :  { %v2378_v49 = vld [vmem:[%s3366_s5 + $0x174] ss:$8 sps:$4 sm:$0xff]   ;;  %v2376_v51 = vld [vmem:[%s3366_s5 + $0x170] ss:$8 sps:$4 sm:$0xff]   ;;  %601 = vmatprep.subr.bf16.mxu1 %v2375_v48  ;;  %v2381_v52 = vld [vmem:[%s3366_s5 + $0xe4] ss:$8 sps:$4 sm:$0xff]  }
  0x56   :  { %869 = vmatprep.subr.bf16.mxu0 %v2378_v49  ;;  %602 = vmatpush1.bf16.msra.mxu1 %v2373_v50  ;;  %v2384_v53 = vld [vmem:[%s3366_s5 + $0x164] ss:$8 sps:$4 sm:$0xff]   ;;  %v2379_v54 = vld [vmem:[%s3366_s5 + $0xe0] ss:$8 sps:$4 sm:$0xff]   ;;  %v2387_v56 = vld [vmem:[%s3366_s5 + $0xd4] ss:$8 sps:$4 sm:$0xff]  }
  0x57   :  { %870 = vmatpush1.bf16.msra.mxu0 %v2376_v51  ;;  %v2382_v55 = vld [vmem:[%s3366_s5 + $0x160] ss:$8 sps:$4 sm:$0xff]   ;;  %603 = vmatprep.subr.bf16.mxu1 %v2381_v52  ;;  %v2390_v57 = vld [vmem:[%s3366_s5 + $0x154] ss:$8 sps:$4 sm:$0xff]   ;;  %v2385_v58 = vld [vmem:[%s3366_s5 + $0xd0] ss:$8 sps:$4 sm:$0xff]  }
  0x58   :  { %871 = vmatprep.subr.bf16.mxu0 %v2384_v53  ;;  %v2388_v59 = vld [vmem:[%s3366_s5 + $0x150] ss:$8 sps:$4 sm:$0xff]   ;;  %v2393_v60 = vld [vmem:[%s3366_s5 + $0xc4] ss:$8 sps:$4 sm:$0xff]   ;;  %v2391_v62 = vld [vmem:[%s3366_s5 + $0xc0] ss:$8 sps:$4 sm:$0xff]  }
  0x59   :  { %v2396_v61 = vld [vmem:[%s3366_s5 + $0x144] ss:$8 sps:$4 sm:$0xff]   ;;  %v2394_v63 = vld [vmem:[%s3366_s5 + $0x140] ss:$8 sps:$4 sm:$0xff]   ;;  %v2399_v0 = vld [vmem:[%s3366_s5 + $0xb4] ss:$8 sps:$4 sm:$0xff]  }
  0x5a   :  { %604 = vmatpush1.bf16.msra.mxu1 %v2379_v54  ;;  %v2402_v1 = vld [vmem:[%s3366_s5 + $0x134] ss:$8 sps:$4 sm:$0xff]   ;;  %v2397_v3 = vld [vmem:[%s3366_s5 + $0xb0] ss:$8 sps:$4 sm:$0xff]   ;;  %v2405_v5 = vld [vmem:[%s3366_s5 + $0xa4] ss:$8 sps:$4 sm:$0xff]  }
  0x5b   :  { %872 = vmatpush1.bf16.msra.mxu0 %v2382_v55  ;;  %605 = vmatprep.subr.bf16.mxu1 %v2387_v56  ;;  %v2400_v4 = vld [vmem:[%s3366_s5 + $0x130] ss:$8 sps:$4 sm:$0xff]   ;;  %v2408_v6 = vld [vmem:[%s3366_s5 + $0x124] ss:$8 sps:$4 sm:$0xff]   ;;  %v2403_v7 = vld [vmem:[%s3366_s5 + $0xa0] ss:$8 sps:$4 sm:$0xff]  }
  0x5c   :  { %873 = vmatprep.subr.bf16.mxu0 %v2390_v57  ;;  %v2406_v8 = vld [vmem:[%s3366_s5 + $0x120] ss:$8 sps:$4 sm:$0xff]   ;;  %v2411_v9 = vld [vmem:[%s3366_s5 + $0x94] ss:$8 sps:$4 sm:$0xff]   ;;  %v2409_v11 = vld [vmem:[%s3366_s5 + $0x90] ss:$8 sps:$4 sm:$0xff]  }
  0x5d   :  { %v2414_v10 = vld [vmem:[%s3366_s5 + $0x114] ss:$8 sps:$4 sm:$0xff]   ;;  %v2412_v12 = vld [vmem:[%s3366_s5 + $0x110] ss:$8 sps:$4 sm:$0xff]   ;;  %v2417_v13 = vld [vmem:[%s3366_s5 + $0x84] ss:$8 sps:$4 sm:$0xff]  }
  0x5e   :  { %606 = vmatpush1.bf16.msra.mxu1 %v2385_v58  ;;  %v2420_v14 = vld [vmem:[%s3366_s5 + $0x104] ss:$8 sps:$4 sm:$0xff]   ;;  %v2415_v15 = vld [vmem:[%s3366_s5 + $0x80] ss:$8 sps:$4 sm:$0xff]   ;;  %v2423_v17 = vld [vmem:[%s3366_s5 + $0x74] ss:$8 sps:$4 sm:$0xff]  }
  0x5f   :  { %874 = vmatpush1.bf16.msra.mxu0 %v2388_v59  ;;  %607 = vmatprep.subr.bf16.mxu1 %v2393_v60  ;;  %v2418_v16 = vld [vmem:[%s3366_s5 + $0x100] ss:$8 sps:$4 sm:$0xff]   ;;  %v2426_v18 = vld [vmem:[%s3366_s5 + $0x274] ss:$8 sps:$4 sm:$0xff]   ;;  %vm516_vm2 = vcmask 1046528   ;;  %vm784_vm3 = vcmask 1045504  }
  0x60   :  { %875 = vmatprep.subr.bf16.mxu0 %v2396_v61  ;;  %v2035_v52 = vld [vmem:[%s3365_s4] ss:$0 sm:$0xff]  ;;  %vm933_vm4 = vcmask 1044480   ;;  %vm1926_vm5 = vcmask 1042432   ;;  %vm1922_vm6 = vcmask 179200   ;;  %vm1970_vm7 = vcmask 9216  }
  0x62   :  { %608 = vmatpush1.bf16.msra.mxu1 %v2391_v62 }
  0x63   :  { %876 = vmatpush1.bf16.msra.mxu0 %v2394_v63  ;;  %609 = vmatprep.subr.bf16.mxu1 %v2399_v0 }
  0x64   :  { %877 = vmatprep.subr.bf16.mxu0 %v2402_v1 }
  0x66   :  { %610 = vmatpush1.bf16.msra.mxu1 %v2397_v3 }
  0x67   :  { %878 = vmatpush1.bf16.msra.mxu0 %v2400_v4  ;;  %611 = vmatprep.subr.bf16.mxu1 %v2405_v5 }
  0x68   :  { %879 = vmatprep.subr.bf16.mxu0 %v2408_v6 }
  0x6a   :  { %612 = vmatpush1.bf16.msra.mxu1 %v2403_v7 }
  0x6b   :  { %880 = vmatpush1.bf16.msra.mxu0 %v2406_v8  ;;  %613 = vmatprep.subr.bf16.mxu1 %v2411_v9 }
  0x6c   :  { %881 = vmatprep.subr.bf16.mxu0 %v2414_v10  ;;  %v2421_v10 = vld [vmem:[%s3366_s5 + $0x70] ss:$8 sps:$4 sm:$0xff]  }
  0x6e   :  { %614 = vmatpush1.bf16.msra.mxu1 %v2409_v11 }
  0x6f   :  { %882 = vmatpush1.bf16.msra.mxu0 %v2412_v12  ;;  %615 = vmatprep.subr.bf16.mxu1 %v2417_v13  ;;  %v2424_v13 = vld [vmem:[%s3366_s5 + $0x270] ss:$8 sps:$4 sm:$0xff]  }
  0x70   :  { %883 = vmatprep.subr.bf16.mxu0 %v2420_v14 }
  0x72   :  { %616 = vmatpush1.bf16.msra.mxu1 %v2415_v15 }
  0x73   :  { %884 = vmatpush1.bf16.msra.mxu0 %v2418_v16  ;;  %724 = vmatprep.subr.bf16.mxu1 %v2423_v17 }
  0x74   :  { %1163 = vmatprep.subr.bf16.mxu0 %v2426_v18  ;;  %v2429_v18 = vld [vmem:[%s3366_s5 + $0x64] ss:$8 sps:$4 sm:$0xff]  }
  0xd0   :  { %v428_v19 = vpop.f32.mrf.mxu1 }
  0xd2   :  { %v430_v20 = vpop.f32.mrf.mxu1 }
  0xd4   :  { %v432_v21 = vpop.f32.mrf.mxu1 }
  0xd6   :  { %v434_v22 = vpop.f32.mrf.mxu1 }
  0xd8   :  { %v438_v23 = vpop.f32.mrf.mxu1 }
  0xda   :  { %v440_v24 = vpop.f32.mrf.mxu1 }
  0xdc   :  { %v442_v27 = vpop.f32.mrf.mxu1 }
  0xde   :  { %v444_v30 = vpop.f32.mrf.mxu1 }
  0xe0   :  { %v448_v33 = vpop.f32.mrf.mxu1 }
  0xe2   :  { %v450_v36 = vpop.f32.mrf.mxu1 }
  0xe4   :  { %v452_v45 = vpop.f32.mrf.mxu1 }
  0xe6   :  { %v454_v56 = vpop.f32.mrf.mxu1 }
 0x102   :  { %v365_v25 = vpop.f32.mrf.mxu0 }
 0x103   :  { %v429_v40 = vadd.f32 %v428_v19, %v365_v25  ;;  %v2432_v19 = vld [vmem:[%s3366_s5 + $0x264] ss:$8 sps:$4 sm:$0xff]   ;;  %v2435_v25 = vld [vmem:[%s3366_s5 + $0x54] ss:$8 sps:$4 sm:$0xff]  }
 0x104   :  { %v367_v26 = vpop.f32.mrf.mxu0 }
 0x105   :  { %v431_v38 = vadd.f32 %v430_v20, %v367_v26  ;;  %v2438_v26 = vld [vmem:[%s3366_s5 + $0x254] ss:$8 sps:$4 sm:$0xff]  }
 0x106   :  { %v369_v28 = vpop.f32.mrf.mxu0 }
 0x107   :  { %v433_v47 = vadd.f32 %v432_v21, %v369_v28  ;;  %v2436_v28 = vld [vmem:[%s3366_s5 + $0x250] ss:$8 sps:$4 sm:$0xff]  }
 0x108   :  { %v371_v29 = vpop.f32.mrf.mxu0 }
 0x109   :  { %v435_v48 = vadd.f32 %v434_v22, %v371_v29  ;;  %v2441_v29 = vld [vmem:[%s3366_s5 + $0x44] ss:$8 sps:$4 sm:$0xff]  }
 0x10a   :  { %v375_v31 = vpop.f32.mrf.mxu0 }
 0x10b   :  { %v439_v58 = vadd.f32 %v438_v23, %v375_v31  ;;  %v2427_v23 = vld [vmem:[%s3366_s5 + $0x60] ss:$8 sps:$4 sm:$0xff]  }
 0x10c   :  { %v377_v32 = vpop.f32.mrf.mxu0  ;;  %v2439_v31 = vld [vmem:[%s3366_s5 + $0x40] ss:$8 sps:$4 sm:$0xff]  }
 0x10d   :  { %v441_v59 = vadd.f32 %v440_v24, %v377_v32  ;;  %v2430_v24 = vld [vmem:[%s3366_s5 + $0x260] ss:$8 sps:$4 sm:$0xff]  }
 0x10e   :  { %v379_v34 = vpop.f32.mrf.mxu0  ;;  %v2442_v32 = vld [vmem:[%s3366_s5 + $0x240] ss:$8 sps:$4 sm:$0xff]  }
 0x10f   :  { %v443_v35 = vadd.f32 %v442_v27, %v379_v34  ;;  %v2433_v27 = vld [vmem:[%s3366_s5 + $0x50] ss:$8 sps:$4 sm:$0xff]   ;;  %v2450_v34 = vld [vmem:[%s3366_s5 + $0x234] ss:$8 sps:$4 sm:$0xff]  }
 0x110   :  { %v381_v37 = vpop.f32.mrf.mxu0 }
 0x111   :  { %v445_v39 = vadd.f32 %v444_v30, %v381_v37  ;;  %v457_v44 = vmax.f32 %v429_v40, %v443_v35  ;;  %v2444_v30 = vld [vmem:[%s3366_s5 + $0x244] ss:$8 sps:$4 sm:$0xff]   ;;  %v2445_v35 = vld [vmem:[%s3366_s5 + $0x30] ss:$8 sps:$4 sm:$0xff]   ;;  %v2454_v40 = vld [vmem:[%s3366_s5 + $0x220] ss:$8 sps:$4 sm:$0xff]  }
 0x112   :  { %v385_v41 = vpop.f32.mrf.mxu0  ;;  %v2453_v37 = vld [vmem:[%s3366_s5 + $0x24] ss:$8 sps:$4 sm:$0xff]  }
 0x113   :  { %v458_v42 = vmax.f32 %v431_v38, %v445_v39  ;;  %v449_v43 = vadd.f32 %v448_v33, %v385_v41  ;;  %v2447_v33 = vld [vmem:[%s3366_s5 + $0x34] ss:$8 sps:$4 sm:$0xff]   ;;  %v2456_v38 = vld [vmem:[%s3366_s5 + $0x224] ss:$8 sps:$4 sm:$0xff]   ;;  %v2451_v39 = vld [vmem:[%s3366_s5 + $0x20] ss:$8 sps:$4 sm:$0xff]  }
 0x114   :  { %v387_v46 = vpop.f32.mrf.mxu0  ;;  %v2459_v41 = vld [vmem:[%s3366_s5 + $0x14] ss:$8 sps:$4 sm:$0xff]  }
 0x115   :  { %v451_v49 = vadd.f32 %v450_v36, %v387_v46  ;;  %v463_v50 = vmax.f32 %v457_v44, %v458_v42  ;;  %v459_v53 = vmax.f32 %v433_v47, %v449_v43  ;;  %v2448_v36 = vld [vmem:[%s3366_s5 + $0x230] ss:$8 sps:$4 sm:$0xff]   ;;  %v2462_v42 = vld [vmem:[%s3366_s5 + $0x214] ss:$8 sps:$4 sm:$0xff]   ;;  %v2468_v46 = vld [vmem:[%s3366_s5 + $0x204] ss:$8 sps:$4 sm:$0xff]  }
 0x116   :  { %v389_v51 = vpop.f32.mrf.mxu0  ;;  %v2457_v43 = vld [vmem:[%s3366_s5 + $0x10] ss:$8 sps:$4 sm:$0xff]   ;;  %v2463_v47 = vld [vmem:[%s3366_s5] ss:$8 sps:$4 sm:$0xff]  }
 0x117   :  { %v460_v54 = vmax.f32 %v435_v48, %v451_v49  ;;  %v453_v55 = vadd.f32 %v452_v45, %v389_v51  ;;  %v473_v62 = vadd.f32 %v2035_v52, %v463_v50  ;;  %v2460_v44 = vld [vmem:[%s3366_s5 + $0x210] ss:$8 sps:$4 sm:$0xff]   ;;  %v2465_v45 = vld [vmem:[%s3366_s5 + $0x4] ss:$8 sps:$4 sm:$0xff]   ;;  %v2466_v48 = vld [vmem:[%s3366_s5 + $0x200] ss:$8 sps:$4 sm:$0xff]  }
 0x118   :  { %v391_v57 = vpop.f32.mrf.mxu0  ;;  %v2471_v49 = vld [vmem:[%s3366_s5 + $0x1f4] ss:$8 sps:$4 sm:$0xff]   ;;  %v2469_v50 = vld [vmem:[%s3366_s5 + $0x1f0] ss:$8 sps:$4 sm:$0xff]  }
 0x119   :  { %v464_v60 = vmax.f32 %v459_v53, %v460_v54  ;;  %v455_v61 = vadd.f32 %v454_v56, %v391_v57  ;;  %v461_v0 = vmax.f32 %v439_v58, %v453_v55  ;;  %v476_v5 = vmax.f32 %v473_v62, 0.0  ;;  %v2472_v53 = vld [vmem:[%s3366_s5 + $0x1e0] ss:$8 sps:$4 sm:$0xff]   ;;  %v2477_v54 = vld [vmem:[%s3366_s5 + $0x1d4] ss:$8 sps:$4 sm:$0xff]  }
 0x11a   :  { %v2475_v55 = vld [vmem:[%s3366_s5 + $0x1d0] ss:$8 sps:$4 sm:$0xff]   ;;  %v2480_v56 = vld [vmem:[%s3366_s5 + $0x1c4] ss:$8 sps:$4 sm:$0xff]   ;;  %v2478_v57 = vld [vmem:[%s3366_s5 + $0x1c0] ss:$8 sps:$4 sm:$0xff]  }
 0x11b   :  { %v2939_v63 = vadd.f32 %v2035_v52, %v464_v60  ;;  %v462_v1 = vmax.f32 %v441_v59, %v455_v61  ;;  %v2483_v58 = vld [vmem:[%s3366_s5 + $0x1b4] ss:$8 sps:$4 sm:$0xff]   ;;  %v2481_v59 = vld [vmem:[%s3366_s5 + $0x1b0] ss:$8 sps:$4 sm:$0xff]   ;;  %v2486_v60 = vld [vmem:[%s3366_s5 + $0x1a4] ss:$8 sps:$4 sm:$0xff]  }
 0x11c   :  { %v2484_v61 = vld [vmem:[%s3366_s5 + $0x1a0] ss:$8 sps:$4 sm:$0xff]   ;;  %v2489_v62 = vld [vmem:[%s3366_s5 + $0x194] ss:$8 sps:$4 sm:$0xff]  }
 0x11d   :  { %v477_v3 = vmax.f32 %v2939_v63, 0.0  ;;  %v465_v4 = vmax.f32 %v461_v0, %v462_v1  ;;  %v2487_v63 = vld [vmem:[%s3366_s5 + $0x190] ss:$8 sps:$4 sm:$0xff]   ;;  %v2492_v0 = vld [vmem:[%s3366_s5 + $0x184] ss:$8 sps:$4 sm:$0xff]  }
 0x11e   :  { %v2490_v1 = vld [vmem:[%s3366_s5 + $0x180] ss:$8 sps:$4 sm:$0xff]  }
 0x11f   :  { %v475_v6 = vadd.f32 %v2035_v52, %v465_v4  ;;  %v2944_v7 = vpack.c.bf16 %v477_v3, %v476_v5  ;;  %v2474_v52 = vld [vmem:[%s3366_s5 + $0x1e4] ss:$8 sps:$4 sm:$0xff]   ;;  %v2495_v4 = vld [vmem:[%s3368_s7 + $0x74] ss:$8 sps:$4 sm:$0xff]   ;;  %v2496_v5 = vld [vmem:[%s3368_s7 + $0xf0] ss:$8 sps:$4 sm:$0xff]  }
 0x121   :  { %v2946_v8 = vmax.f32 %v475_v6, 0.0  ;;  %v517_v11 = vrot.slane %v2944_v7, 1  ;;  %v785_v12 = vrot.slane %v2944_v7, 2  ;;  %v934_v16 = vrot.slane %v2944_v7, 3  ;;  %v2498_v6 = vld [vmem:[%s3368_s7 + $0xf4] ss:$8 sps:$4 sm:$0xff]  }
 0x123   :  { %v496_v9 = vpack.c.bf16 %v2946_v8, %v2946_v8  ;;  %v1065_v51 = vpack.c.bf16 %v2946_v8, %v477_v3  ;;  %v2493_v3 = vld [vmem:[%s3368_s7 + $0x70] ss:$8 sps:$4 sm:$0xff]   ;;  %v2504_v8 = vld [vmem:[%s3368_s7 + $0xe4] ss:$8 sps:$4 sm:$0xff]  }
 0x125   :  { %v518_v14 = vrot.slane %v496_v9, 1  ;;  %v786_v15 = vrot.slane %v496_v9, 2  ;;  %v935_v17 = vrot.slane %v496_v9, 3  ;;  %v2499_v9 = vld [vmem:[%s3368_s7 + $0x60] ss:$8 sps:$4 sm:$0xff]  }
 0x127   :  { %v519_v20 = vsel %vm516_vm2, %v517_v11, %v518_v14  ;;  %v787_v21 = vsel %vm784_vm3, %v785_v12, %v786_v15  ;;  %v2965_v22 = vsel %vm933_vm4, %v934_v16, %v935_v17  ;;  %v2507_v11 = vld [vmem:[%s3368_s7 + $0x54] ss:$8 sps:$4 sm:$0xff]   ;;  %v2508_v14 = vld [vmem:[%s3368_s7 + $0xd0] ss:$8 sps:$4 sm:$0xff]   ;;  %v2513_v15 = vld [vmem:[%s3368_s7 + $0x44] ss:$8 sps:$4 sm:$0xff]  }
 0x128   :  { %634 = vmatmul.mubr.bf16.vlgmr.msra.gmra.mxu1 %v519_v20  ;;  %902 = vmatmul.mubr.bf16.vlgmr.msra.gmra.mxu0 %v787_v21  ;;  %v2510_v12 = vld [vmem:[%s3368_s7 + $0xd4] ss:$8 sps:$4 sm:$0xff]   ;;  %v2511_v16 = vld [vmem:[%s3368_s7 + $0x40] ss:$8 sps:$4 sm:$0xff]   ;;  %v2516_v17 = vld [vmem:[%s3368_s7 + $0xc4] ss:$8 sps:$4 sm:$0xff]  }
 0x129   :  { %725 = vmatpush1.bf16.msra.mxu1 %v2421_v10  ;;  %1164 = vmatpush1.bf16.msra.mxu0 %v2424_v13  ;;  %v2502_v10 = vld [vmem:[%s3368_s7 + $0xe0] ss:$8 sps:$4 sm:$0xff]   ;;  %v2505_v13 = vld [vmem:[%s3368_s7 + $0x50] ss:$8 sps:$4 sm:$0xff]   ;;  %v2522_v21 = vld [vmem:[%s3368_s7 + $0xb4] ss:$8 sps:$4 sm:$0xff]  }
 0x12a   :  { %726 = vmatprep.subr.bf16.mxu1 %v2429_v18  ;;  %1165 = vmatprep.subr.bf16.mxu0 %v2432_v19  ;;  %v2514_v18 = vld [vmem:[%s3368_s7 + $0xc0] ss:$8 sps:$4 sm:$0xff]   ;;  %v2519_v19 = vld [vmem:[%s3368_s7 + $0x34] ss:$8 sps:$4 sm:$0xff]   ;;  %v2517_v20 = vld [vmem:[%s3368_s7 + $0x30] ss:$8 sps:$4 sm:$0xff]  }
 0x12b   :  { %756 = vmatprep.mubr.bf16.mxu1 %v2621_v2  ;;  %1195 = vmatprep.mubr.bf16.mxu0 %v2621_v2 }
 0x12d   :  { %727 = vmatpush1.bf16.msra.mxu1 %v2427_v23  ;;  %1166 = vmatpush1.bf16.msra.mxu0 %v2430_v24  ;;  %v2525_v23 = vld [vmem:[%s3368_s7 + $0x24] ss:$8 sps:$4 sm:$0xff]   ;;  %v2523_v24 = vld [vmem:[%s3368_s7 + $0x20] ss:$8 sps:$4 sm:$0xff]  }
 0x12e   :  { %728 = vmatprep.subr.bf16.mxu1 %v2435_v25  ;;  %1167 = vmatprep.subr.bf16.mxu0 %v2438_v26  ;;  %v2528_v25 = vld [vmem:[%s3368_s7 + $0xa4] ss:$8 sps:$4 sm:$0xff]   ;;  %v2526_v26 = vld [vmem:[%s3368_s7 + $0xa0] ss:$8 sps:$4 sm:$0xff]  }
 0x131   :  { %729 = vmatpush1.bf16.msra.mxu1 %v2433_v27  ;;  %1168 = vmatpush1.bf16.msra.mxu0 %v2436_v28  ;;  %v2531_v27 = vld [vmem:[%s3368_s7 + $0x14] ss:$8 sps:$4 sm:$0xff]   ;;  %v2529_v28 = vld [vmem:[%s3368_s7 + $0x10] ss:$8 sps:$4 sm:$0xff]  }
 0x132   :  { %730 = vmatprep.subr.bf16.mxu1 %v2441_v29  ;;  %1169 = vmatprep.subr.bf16.mxu0 %v2444_v30  ;;  %v2534_v29 = vld [vmem:[%s3368_s7 + $0x94] ss:$8 sps:$4 sm:$0xff]   ;;  %v2532_v30 = vld [vmem:[%s3368_s7 + $0x90] ss:$8 sps:$4 sm:$0xff]  }
 0x135   :  { %731 = vmatpush1.bf16.msra.mxu1 %v2439_v31  ;;  %1170 = vmatpush1.bf16.msra.mxu0 %v2442_v32  ;;  %v2537_v31 = vld [vmem:[%s3368_s7 + $0x4] ss:$8 sps:$4 sm:$0xff]   ;;  %v2535_v32 = vld [vmem:[%s3368_s7] ss:$8 sps:$4 sm:$0xff]  }
 0x136   :  { %732 = vmatprep.subr.bf16.mxu1 %v2447_v33  ;;  %1171 = vmatprep.subr.bf16.mxu0 %v2450_v34  ;;  %v2540_v33 = vld [vmem:[%s3368_s7 + $0x84] ss:$8 sps:$4 sm:$0xff]   ;;  %v2538_v34 = vld [vmem:[%s3368_s7 + $0x80] ss:$8 sps:$4 sm:$0xff]  }
 0x139   :  { %733 = vmatpush1.bf16.msra.mxu1 %v2445_v35  ;;  %1172 = vmatpush1.bf16.msra.mxu0 %v2448_v36  ;;  %v2543_v35 = vld [vmem:[%s3368_s7 + $0x1f4] ss:$8 sps:$4 sm:$0xff]  }
 0x13a   :  { %734 = vmatprep.subr.bf16.mxu1 %v2453_v37  ;;  %1173 = vmatprep.subr.bf16.mxu0 %v2456_v38  ;;  %v2546_v36 = vld [vmem:[%s3368_s7 + $0x174] ss:$8 sps:$4 sm:$0xff]   ;;  %v1800_v37 = vld [vmem:[%s3362_s1] sm:$0x3] }
 0x13b   :  { %1804 = vperm.xlu0 %2307, %v1800_v37   ;;  %v2565_v37 = vld [vmem:[%s3368_s7 + $0x1b0] ss:$8 sps:$4 sm:$0xff]  }
 0x13d   :  { %735 = vmatpush1.bf16.msra.mxu1 %v2451_v39  ;;  %1174 = vmatpush1.bf16.msra.mxu0 %v2454_v40 }
 0x13e   :  { %736 = vmatprep.subr.bf16.mxu1 %v2459_v41  ;;  %1175 = vmatprep.subr.bf16.mxu0 %v2462_v42 }
 0x141   :  { %737 = vmatpush1.bf16.msra.mxu1 %v2457_v43  ;;  %1176 = vmatpush1.bf16.msra.mxu0 %v2460_v44 }
 0x142   :  { %738 = vmatprep.subr.bf16.mxu1 %v2465_v45  ;;  %1177 = vmatprep.subr.bf16.mxu0 %v2468_v46 }
 0x145   :  { %739 = vmatpush1.bf16.msra.mxu1 %v2463_v47  ;;  %1178 = vmatpush1.bf16.msra.mxu0 %v2466_v48 }
 0x146   :  { %1018 = vmatprep.subr.bf16.mxu1 %v2471_v49  ;;  %1465 = vmatprep.subr.bf16.mxu0 %v2495_v4 }
 0x148   :  { %757 = vmatmul.mubr.bf16.vlgmr.msra.gmra.mxu1 %v2944_v7  ;;  %1196 = vmatmul.mubr.bf16.vlgmr.msra.gmra.mxu0 %v1065_v51  ;;  %v2501_v7 = vld [vmem:[%s3368_s7 + $0x64] ss:$8 sps:$4 sm:$0xff]  }
 0x149   :  { %1019 = vmatpush1.bf16.msra.mxu1 %v2469_v50  ;;  %1050 = vmatprep.mubr.bf16.mxu1 %v2621_v2 }
 0x14a   :  { %1020 = vmatprep.subr.bf16.mxu1 %v2474_v52  ;;  %1497 = vmatprep.mubr.bf16.mxu0 %v2621_v2 }
 0x14b   :  { %1466 = vmatpush1.bf16.msra.mxu0 %v2493_v3 }
 0x14c   :  { %1467 = vmatprep.subr.bf16.mxu0 %v2501_v7 }
 0x14d   :  { %1021 = vmatpush1.bf16.msra.mxu1 %v2472_v53 }
 0x14e   :  { %1022 = vmatprep.subr.bf16.mxu1 %v2477_v54 }
 0x14f   :  { %1468 = vmatpush1.bf16.msra.mxu0 %v2499_v9 }
 0x150   :  { %1469 = vmatprep.subr.bf16.mxu0 %v2507_v11  ;;  %v2541_v11 = vld [vmem:[%s3368_s7 + $0x1f0] ss:$8 sps:$4 sm:$0xff]  }
 0x151   :  { %1023 = vmatpush1.bf16.msra.mxu1 %v2475_v55 }
 0x152   :  { %1024 = vmatprep.subr.bf16.mxu1 %v2480_v56 }
 0x153   :  { %1470 = vmatpush1.bf16.msra.mxu0 %v2505_v13 }
 0x154   :  { %1471 = vmatprep.subr.bf16.mxu0 %v2513_v15  ;;  %v2549_v15 = vld [vmem:[%s3368_s7 + $0x1e4] ss:$8 sps:$4 sm:$0xff]  }
 0x155   :  { %1025 = vmatpush1.bf16.msra.mxu1 %v2478_v57 }
 0x156   :  { %1026 = vmatprep.subr.bf16.mxu1 %v2483_v58 }
 0x157   :  { %1472 = vmatpush1.bf16.msra.mxu0 %v2511_v16  ;;  %v2544_v16 = vld [vmem:[%s3368_s7 + $0x170] ss:$8 sps:$4 sm:$0xff]  }
 0x158   :  { %1473 = vmatprep.subr.bf16.mxu0 %v2519_v19  ;;  %v2552_v19 = vld [vmem:[%s3368_s7 + $0x164] ss:$8 sps:$4 sm:$0xff]  }
 0x159   :  { %1027 = vmatpush1.bf16.msra.mxu1 %v2481_v59 }
 0x15a   :  { %1028 = vmatprep.subr.bf16.mxu1 %v2486_v60 }
 0x15b   :  { %1474 = vmatpush1.bf16.msra.mxu0 %v2517_v20 }
 0x15c   :  { %1475 = vmatprep.subr.bf16.mxu0 %v2525_v23  ;;  %v2555_v23 = vld [vmem:[%s3368_s7 + $0x1d4] ss:$8 sps:$4 sm:$0xff]  }
 0x15d   :  { %1029 = vmatpush1.bf16.msra.mxu1 %v2484_v61 }
 0x15e   :  { %1030 = vmatprep.subr.bf16.mxu1 %v2489_v62  ;;  %v2180_v62 = vld [vmem:[%s3367_s6] ss:$0 sm:$0xff] }
 0x15f   :  { %1476 = vmatpush1.bf16.msra.mxu0 %v2523_v24  ;;  %v2550_v24 = vld [vmem:[%s3368_s7 + $0x160] ss:$8 sps:$4 sm:$0xff]  }
 0x160   :  { %1477 = vmatprep.subr.bf16.mxu0 %v2531_v27  ;;  %v2553_v27 = vld [vmem:[%s3368_s7 + $0x1d0] ss:$8 sps:$4 sm:$0xff]  }
 0x161   :  { %1031 = vmatpush1.bf16.msra.mxu1 %v2487_v63 }
 0x162   :  { %1032 = vmatprep.subr.bf16.mxu1 %v2492_v0 }
 0x163   :  { %1478 = vmatpush1.bf16.msra.mxu0 %v2529_v28 }
 0x164   :  { %1479 = vmatprep.subr.bf16.mxu0 %v2537_v31  ;;  %v2564_v31 = vld [vmem:[%s3368_s7 + $0x144] ss:$8 sps:$4 sm:$0xff]  }
 0x165   :  { %1033 = vmatpush1.bf16.msra.mxu1 %v2490_v1 }
 0x166   :  { %1344 = vmatprep.subr.bf16.mxu1 %v2498_v6 }
 0x167   :  { %1480 = vmatpush1.bf16.msra.mxu0 %v2535_v32  ;;  %v2559_v32 = vld [vmem:[%s3368_s7 + $0x1c0] ss:$8 sps:$4 sm:$0xff]  }
 0x168   :  { %1051 = vmatmul.mubr.bf16.vlgmr.msra.gmra.mxu1 %v2965_v22  ;;  %v2520_v22 = vld [vmem:[%s3368_s7 + $0xb0] ss:$8 sps:$4 sm:$0xff]   ;;  %1751 = vmatprep.subr.bf16.mxu0 %v2543_v35  ;;  %v2562_v35 = vld [vmem:[%s3368_s7 + $0x140] ss:$8 sps:$4 sm:$0xff]  }
 0x169   :  { %1376 = vmatprep.mubr.bf16.mxu1 %v2621_v2  ;;  %1345 = vmatpush1.bf16.msra.mxu1 %v2496_v5 }
 0x16a   :  { %1346 = vmatprep.subr.bf16.mxu1 %v2504_v8 }
 0x16d   :  { %1347 = vmatpush1.bf16.msra.mxu1 %v2502_v10 }
 0x16e   :  { %1348 = vmatprep.subr.bf16.mxu1 %v2510_v12 }
 0x171   :  { %1349 = vmatpush1.bf16.msra.mxu1 %v2508_v14 }
 0x172   :  { %1350 = vmatprep.subr.bf16.mxu1 %v2516_v17 }
 0x175   :  { %1351 = vmatpush1.bf16.msra.mxu1 %v2514_v18 }
 0x176   :  { %1352 = vmatprep.subr.bf16.mxu1 %v2522_v21  ;;  %v2547_v21 = vld [vmem:[%s3368_s7 + $0x1e0] ss:$8 sps:$4 sm:$0xff]  }
 0x179   :  { %1353 = vmatpush1.bf16.msra.mxu1 %v2520_v22 }
 0x17a   :  { %1354 = vmatprep.subr.bf16.mxu1 %v2528_v25 }
 0x17d   :  { %1355 = vmatpush1.bf16.msra.mxu1 %v2526_v26  ;;  %v2558_v26 = vld [vmem:[%s3368_s7 + $0x154] ss:$8 sps:$4 sm:$0xff]  }
 0x17e   :  { %1356 = vmatprep.subr.bf16.mxu1 %v2534_v29  ;;  %v2561_v29 = vld [vmem:[%s3368_s7 + $0x1c4] ss:$8 sps:$4 sm:$0xff]  }
 0x181   :  { %1357 = vmatpush1.bf16.msra.mxu1 %v2532_v30  ;;  %v2556_v30 = vld [vmem:[%s3368_s7 + $0x150] ss:$8 sps:$4 sm:$0xff]  }
 0x182   :  { %1358 = vmatprep.subr.bf16.mxu1 %v2540_v33 }
 0x185   :  { %1359 = vmatpush1.bf16.msra.mxu1 %v2538_v34  ;;  %v2567_v34 = vld [vmem:[%s3368_s7 + $0x1b4] ss:$8 sps:$4 sm:$0xff]  }
 0x186   :  { %1608 = vmatprep.subr.bf16.mxu1 %v2546_v36  ;;  %v2570_v36 = vld [vmem:[%s3368_s7 + $0x134] ss:$8 sps:$4 sm:$0xff]  }
 0x1e8   :  { %v635_v38 = vpop.f32.mrf.mxu1  ;;  %v903_v42 = vpop.f32.mrf.mxu0 }
 0x1ea   :  { %v637_v39 = vpop.f32.mrf.mxu1  ;;  %v905_v44 = vpop.f32.mrf.mxu0 }
 0x1ec   :  { %v639_v40 = vpop.f32.mrf.mxu1  ;;  %v907_v46 = vpop.f32.mrf.mxu0 }
 0x1ee   :  { %v641_v41 = vpop.f32.mrf.mxu1  ;;  %v909_v50 = vpop.f32.mrf.mxu0 }
 0x208   :  { %v758_v43 = vpop.f32.mrf.mxu1  ;;  %v1197_v53 = vpop.f32.mrf.mxu0 }
 0x209   :  { %v759_v48 = vadd.f32 %v758_v43, %v635_v38 }
 0x20a   :  { %v760_v45 = vpop.f32.mrf.mxu1  ;;  %v1199_v59 = vpop.f32.mrf.mxu0 }
 0x20b   :  { %v761_v49 = vadd.f32 %v760_v45, %v637_v39  ;;  %v912_v52 = vadd.f32 %v903_v42, %v759_v48  ;;  %v2573_v39 = vld [vmem:[%s3368_s7 + $0x1a4] ss:$8 sps:$4 sm:$0xff]   ;;  %v2571_v42 = vld [vmem:[%s3368_s7 + $0x1a0] ss:$8 sps:$4 sm:$0xff]  }
 0x20c   :  { %v762_v47 = vpop.f32.mrf.mxu1  ;;  %v1201_v10 = vpop.f32.mrf.mxu0  ;;  %v2574_v45 = vld [vmem:[%s3368_s7 + $0x120] ss:$8 sps:$4 sm:$0xff]  }
 0x20d   :  { %v913_v56 = vadd.f32 %v905_v44, %v761_v49  ;;  %v763_v5 = vadd.f32 %v762_v47, %v639_v40  ;;  %v2568_v40 = vld [vmem:[%s3368_s7 + $0x130] ss:$8 sps:$4 sm:$0xff]   ;;  %v2579_v44 = vld [vmem:[%s3368_s7 + $0x194] ss:$8 sps:$4 sm:$0xff]   ;;  %v2585_v49 = vld [vmem:[%s3368_s7 + $0x184] ss:$8 sps:$4 sm:$0xff]  }
 0x20e   :  { %v764_v51 = vpop.f32.mrf.mxu1  ;;  %v1203_v20 = vpop.f32.mrf.mxu0  ;;  %v2577_v47 = vld [vmem:[%s3368_s7 + $0x190] ss:$8 sps:$4 sm:$0xff]  }
 0x20f   :  { %v765_v3 = vadd.f32 %v764_v51, %v641_v41  ;;  %v914_v12 = vadd.f32 %v907_v46, %v763_v5  ;;  %v2576_v41 = vld [vmem:[%s3368_s7 + $0x124] ss:$8 sps:$4 sm:$0xff]   ;;  %v2582_v46 = vld [vmem:[%s3368_s7 + $0x114] ss:$8 sps:$4 sm:$0xff]  }
 0x210   :  { %v2588_v51 = vld [vmem:[%s3368_s7 + $0x104] ss:$8 sps:$4 sm:$0xff]  }
 0x211   :  { %v915_v8 = vadd.f32 %v909_v50, %v765_v3  ;;  %v2580_v50 = vld [vmem:[%s3368_s7 + $0x110] ss:$8 sps:$4 sm:$0xff]   ;;  %v2598_v3 = vld [vmem:[%s3372_s11 + $0x40] sm:$0xff]  }
 0x228   :  { %v1052_v54 = vpop.f32.mrf.mxu1 }
 0x229   :  { %v1061_v55 = vadd.f32 %v1052_v54, %v912_v52  ;;  %v2583_v52 = vld [vmem:[%s3368_s7 + $0x180] ss:$8 sps:$4 sm:$0xff]  }
 0x22a   :  { %v1054_v57 = vpop.f32.mrf.mxu1  ;;  %v2586_v54 = vld [vmem:[%s3368_s7 + $0x100] ss:$8 sps:$4 sm:$0xff]  }
 0x22b   :  { %v1062_v58 = vadd.f32 %v1054_v57, %v913_v56  ;;  %v1206_v60 = vadd.f32 %v1197_v53, %v1061_v55  ;;  %v2589_v56 = vld [vmem:[%s3372_s11 + $0x38] sm:$0xff]   ;;  %v2590_v57 = vld [vmem:[%s3372_s11 + $0x30] sm:$0xff]  }
 0x22c   :  { %v1056_v1 = vpop.f32.mrf.mxu1 }
 0x22d   :  { %v1207_v61 = vadd.f32 %v1199_v59, %v1062_v58  ;;  %v1063_v17 = vadd.f32 %v1056_v1, %v914_v12  ;;  %v2591_v58 = vld [vmem:[%s3372_s11 + $0x28] sm:$0xff]   ;;  %v2592_v59 = vld [vmem:[%s3372_s11 + $0x20] sm:$0xff]   ;;  %v1808_v12 = vlaneseq }
 0x22e   :  { %v1058_v7 = vpop.f32.mrf.mxu1 }
 0x22f   :  { %v1210_v63 = vmax.f32 %v1206_v60, %v1207_v61  ;;  %v1064_v13 = vadd.f32 %v1058_v7, %v915_v8  ;;  %v1208_v25 = vadd.f32 %v1201_v10, %v1063_v17  ;;  %v2593_v60 = vld [vmem:[%s3372_s11 + $0x18] sm:$0xff]   ;;  %v2594_v61 = vld [vmem:[%s3372_s11 + $0x10] sm:$0xff]   ;;  %v1795_v17 = vld [vmem:[%s3369_s8] sm:$0x3] }
 0x231   :  { %v1219_v0 = vadd.f32 %v2180_v62, %v1210_v63  ;;  %v1209_v22 = vadd.f32 %v1203_v20, %v1064_v13  ;;  %v2596_v63 = vld [vmem:[%s3372_s11] sm:$0xff]   ;;  %v1809_v13 = vshrl.u32 %v1808_v12, 7 }
 0x233   :  { %v1221_v4 = vmax.f32 %v1219_v0, 0.0  ;;  %v1211_v28 = vmax.f32 %v1208_v25, %v1209_v22  ;;  %v2597_v0 = vld [vmem:[%s3372_s11 + $0x48] ss:$0 sps:$4 sm:$0x77]   ;;  %v1805_v22 = vpop.permute.xlu0 %1804 }
 0x234   :  { %v1928_v1 = vsel %vm1926_vm5, %v2597_v0, 0 }
 0x235   :  { %v1224_v6 = vrot.slane %v1221_v4, 2  ;;  %v1220_v33 = vadd.f32 %v2180_v62, %v1211_v28  ;;  %v2595_v62 = vld [vmem:[%s3372_s11 + $0x8] sm:$0xff]  }
 0x237   :  { %v1226_v9 = vmax.f32 %v1221_v4, %v1224_v6  ;;  %v1222_v38 = vmax.f32 %v1220_v33, 0.0 }
 0x239   :  { %v1227_v14 = vpack.c.bf16 %v1226_v9, %v1226_v9  ;;  %v1507_v43 = vrot.slane %v1222_v38, 2 }
 0x23b   :  { %1498 = vmatmul.mubr.bf16.vlgmr.msra.gmra.mxu0 %v1227_v14  ;;  %v1262_v18 = vrot.slane %v1227_v14, 2  ;;  %v1509_v48 = vmax.f32 %v1222_v38, %v1507_v43  ;;  %v1796_v14 = vld [vmem:[%s3370_s9] sm:$0x3]  ;;  %s2622_s9 = smov [#allocation3]  }
 0x23c   :  { %1752 = vmatpush1.bf16.msra.mxu0 %v2541_v11  ;;  %1783 = vmatprep.mubr.bf16.mxu0 %v2621_v2 }
 0x23d   :  { %1377 = vmatmul.mubr.bf16.vlgmr.msra.gmra.mxu1 %v1262_v18  ;;  %1753 = vmatprep.subr.bf16.mxu0 %v2549_v15  ;;  %v1510_v53 = vpack.c.bf16 %v1509_v48, %v1509_v48  ;;  %v1801_v18 = vld [vmem:[%s3371_s10] sm:$0x3]  ;;  %s1978_s10 = sshll.u32 %s2622_s9, 4  ;;  %s1979_s10 = int_to_ptr.vmem [resolvable:$true] %s1978_s10 }
 0x23e   :  { %1609 = vmatpush1.bf16.msra.mxu1 %v2544_v16  ;;  %1640 = vmatprep.mubr.bf16.mxu1 %v2621_v2  ;;  %v1810_v16 = vsub.s32 0, %v1809_v13  ;;  %s2599_s0 = scalar_lea.vmem %s1979_s10, 32  ;;  %p2604_p1 = scmp.lt.s32.totalorder %s1979_s10, %s1979_s10 }
 0x23f   :  { %1610 = vmatprep.subr.bf16.mxu1 %v2552_v19  ;;  %v1669_v55 = vrot.slane %v1510_v53, 2  ;;  %v1814_v19 = vsub.s32 1, %v1809_v13  ;;  %p2600_p0 = scmp.ne.s32.totalorder %s1979_s10, %s2599_s0  ;;  %p2605_p2 = scmp.lt.s32.totalorder %s2599_s0, %s2599_s0 }
 0x240   :  { %1754 = vmatpush1.bf16.msra.mxu0 %v2547_v21  ;;  %v1811_v21 = vrot.slane %v1801_v18, %v1810_v16 }
 0x241   :  { %1755 = vmatprep.subr.bf16.mxu0 %v2555_v23  ;;  %v1815_v23 = vrot.slane %v1801_v18, %v1814_v19  ;;  %p2606_p3 = por %p2605_p2, %p2604_p1 }
 0x242   :  { %1611 = vmatpush1.bf16.msra.mxu1 %v2550_v24  ;;  %v1818_v25 = vmul.f32 %v1811_v21, %v1805_v22 }
 0x243   :  { %1612 = vmatprep.subr.bf16.mxu1 %v2558_v26  ;;  %p2607_p4 = pnand %p2606_p3, %p2600_p0 }
 0x244   :  { %1756 = vmatpush1.bf16.msra.mxu0 %v2553_v27 }
 0x245   :  { %1757 = vmatprep.subr.bf16.mxu0 %v2561_v29  ;;  %v1819_v29 = vmul.f32 %v1815_v23, %v1805_v22 }
 0x246   :  { %1613 = vmatpush1.bf16.msra.mxu1 %v2556_v30 }
 0x247   :  { %1614 = vmatprep.subr.bf16.mxu1 %v2564_v31 }
 0x248   :  { %1758 = vmatpush1.bf16.msra.mxu0 %v2559_v32 }
 0x249   :  { %1759 = vmatprep.subr.bf16.mxu0 %v2567_v34 }
 0x24a   :  { %1615 = vmatpush1.bf16.msra.mxu1 %v2562_v35 }
 0x24b   :  { %1616 = vmatprep.subr.bf16.mxu1 %v2570_v36 }
 0x24c   :  { %1760 = vmatpush1.bf16.msra.mxu0 %v2565_v37 }
 0x24d   :  { %1761 = vmatprep.subr.bf16.mxu0 %v2573_v39 }
 0x24e   :  { %1617 = vmatpush1.bf16.msra.mxu1 %v2568_v40 }
 0x24f   :  { %1618 = vmatprep.subr.bf16.mxu1 %v2576_v41 }
 0x250   :  { %1762 = vmatpush1.bf16.msra.mxu0 %v2571_v42 }
 0x251   :  { %1763 = vmatprep.subr.bf16.mxu0 %v2579_v44 }
 0x252   :  { %1619 = vmatpush1.bf16.msra.mxu1 %v2574_v45 }
 0x253   :  { %1620 = vmatprep.subr.bf16.mxu1 %v2582_v46 }
 0x254   :  { %1764 = vmatpush1.bf16.msra.mxu0 %v2577_v47 }
 0x255   :  { %1765 = vmatprep.subr.bf16.mxu0 %v2585_v49 }
 0x256   :  { %1621 = vmatpush1.bf16.msra.mxu1 %v2580_v50  ;;  %v2293_v50 = vld [vmem:[%s3373_s12] ss:$0 sm:$0xff] }
 0x257   :  { %1622 = vmatprep.subr.bf16.mxu1 %v2588_v51 }
 0x258   :  { %1766 = vmatpush1.bf16.msra.mxu0 %v2583_v52 }
 0x25a   :  { %1623 = vmatpush1.bf16.msra.mxu1 %v2586_v54 }
 0x25b   :  { %1784 = vmatmul.mubr.bf16.vlgmr.msra.gmra.mxu0 %v1669_v55  ;;  %1930 = vmatprep.subr.bf16.mxu1 %v2621_v2 }
 0x25d   :  { %1641 = vmatmul.mubr.bf16.vlgmr.msra.gmra.mxu1 %v1510_v53 }
 0x25e   :  { %1931 = vmatpush1.bf16.msra.mxu1 %v2589_v56 }
 0x25f   :  { %1932 = vmatprep.subr.bf16.mxu1 %v2621_v2 }
 0x262   :  { %1933 = vmatpush1.bf16.msra.mxu1 %v2590_v57 }
 0x263   :  { %1934 = vmatprep.subr.bf16.mxu1 %v2621_v2 }
 0x266   :  { %1935 = vmatpush1.bf16.msra.mxu1 %v2591_v58 }
 0x267   :  { %1936 = vmatprep.subr.bf16.mxu1 %v2621_v2 }
 0x26a   :  { %1937 = vmatpush1.bf16.msra.mxu1 %v2592_v59 }
 0x26b   :  { %1938 = vmatprep.subr.bf16.mxu1 %v2621_v2 }
 0x26e   :  { %1939 = vmatpush1.bf16.msra.mxu1 %v2593_v60 }
 0x26f   :  { %1940 = vmatprep.subr.bf16.mxu1 %v2621_v2 }
 0x272   :  { %1941 = vmatpush1.bf16.msra.mxu1 %v2594_v61 }
 0x273   :  { %1942 = vmatprep.subr.bf16.mxu1 %v2621_v2 }
 0x276   :  { %1943 = vmatpush1.bf16.msra.mxu1 %v2595_v62 }
 0x277   :  { %1944 = vmatprep.subr.bf16.mxu1 %v2621_v2 }
 0x27a   :  { %1945 = vmatpush1.bf16.msra.mxu1 %v2596_v63 }
 0x27b   :  { %1958 = vmatprep.subr.bf16.mxu1 %v2621_v2 }
 0x27e   :  { %1959 = vmatpush2.bf16.msra.mxu1 %v1928_v1 }
 0x27f   :  { %1960 = vmatprep.subr.bf16.mxu1 %v2621_v2  ;;  %v1797_v2 = vstv %s3363_s2 }
 0x280   :  { %v1798_v15 = vmul.f32 %v1797_v2, %v1796_v14 }
 0x282   :  { %1961 = vmatpush2.bf16.msra.mxu1 %v2598_v3  ;;  %v1799_v20 = vadd.f32 %v1798_v15, %v1795_v17 }
 0x284   :  { %v1824_v24 = vrot.slane %v1799_v20, %v1810_v16  ;;  %v1828_v28 = vrot.slane %v1799_v20, %v1814_v19 }
 0x286   :  { %v1831_v33 = vadd.f32 %v1824_v24, %v1818_v25  ;;  %v1832_v37 = vadd.f32 %v1828_v28, %v1819_v29 }
 0x2fb   :  { %v1499_v4 = vpop.f32.mrf.mxu0 }
 0x2fd   :  { %v1378_v5 = vpop.f32.mrf.mxu1  ;;  %v1501_v6 = vpop.f32.mrf.mxu0 }
 0x2fe   :  { %v1500_v27 = vadd.f32 %v1499_v4, %v1378_v5 }
 0x2ff   :  { %v1380_v7 = vpop.f32.mrf.mxu1  ;;  %v1503_v8 = vpop.f32.mrf.mxu0 }
 0x300   :  { %v1502_v32 = vadd.f32 %v1501_v6, %v1380_v7 }
 0x301   :  { %v1382_v9 = vpop.f32.mrf.mxu1  ;;  %v1504_v10 = vpop.f32.mrf.mxu0 }
 0x303   :  { %v1383_v11 = vpop.f32.mrf.mxu1 }
 0x31b   :  { %v1785_v26 = vpop.f32.mrf.mxu0 }
 0x31d   :  { %v1642_v30 = vpop.f32.mrf.mxu1  ;;  %v1787_v31 = vpop.f32.mrf.mxu0 }
 0x31e   :  { %v1649_v34 = vadd.f32 %v1642_v30, %v1500_v27 }
 0x31f   :  { %v1644_v35 = vpop.f32.mrf.mxu1  ;;  %v1789_v36 = vpop.f32.mrf.mxu0 }
 0x320   :  { %v1792_v38 = vadd.f32 %v1785_v26, %v1649_v34  ;;  %v1650_v39 = vadd.f32 %v1644_v35, %v1502_v32 }
 0x321   :  { %v1646_v40 = vpop.f32.mrf.mxu1  ;;  %v1790_v41 = vpop.f32.mrf.mxu0 }
 0x322   :  { %v1833_v42 = vadd.f32 %v1831_v33, %v1792_v38  ;;  %v1793_v43 = vadd.f32 %v1787_v31, %v1650_v39 }
 0x323   :  { %v1647_v44 = vpop.f32.mrf.mxu1 }
 0x324   :  { %v1834_v45 = vadd.f32 %v1832_v37, %v1793_v43  ;;  %v1835_v46 = vmax.f32 %v1833_v42, 0.0 }
 0x326   :  { %v1836_v47 = vmax.f32 %v1834_v45, 0.0  ;;  %v1837_v49 = vpack.c.bf16 %v1835_v46, %v1835_v46 }
 0x328   :  { %v1838_v48 = vpack.c.bf16 %v1836_v47, %v1836_v47 }
 0x32a   :  { %2304 = vmatprep.mubr.msk.bf16.mxu1 %vm1922_vm6, %v1838_v48 }
 0x32b   :  { %1963 = vmatmul.mubr.bf16.vlgmr.msra.gmra.mxu1 %v1837_v49 }
 0x3eb   :  { %v1964_v51 = vpop.f32.mrf.mxu1 }
 0x3ec   :  { %v1965_v52 = vadd.f32 %v2293_v50, %v1964_v51 }
 0x3ed   :  { %v1966_v53 = vpop.f32.mrf.mxu1 }
 0x3ee   :  { %1971 = vst.msk [vmem:[#allocation3] sm:$0x3] %vm1970_vm7, %v1965_v52 }
 0x3ef   :  { %v1967_v54 = vpop.f32.mrf.mxu1 }
 0x3f0   :  { %2610 = shalt.err (!%p2607_p4)
}
 0x3f1   :  { %1981 = dma.vmem_to_hbm [thread:$0]  %s1979_s10, 32, %s3374_s13, [#allocation4]   ;;  %v1968_v55 = vpop.f32.mrf.mxu1 }
 0x3f2   :  { %2619 = dma.done.wait [#allocation4], 32  }
 0x3f3   :  { %2620 = vsyncadd [#allocation4], 4294967264 }
 0x3f4   :  { %1985 = vsyncpa [#allocation4], 1 }

</bundles_post_ra>
